<compile_context>
chip_gen: v6e
topology: v6e:2x2x1
jax: 0.10.0
libtpu: 0.0.40
codegen_flags: <defaults>
</compile_context>

<pallas_src>
import functools

import jax
import jax.numpy as jnp
from jax.experimental import pallas as pl
from jax.experimental.pallas import tpu as pltpu

_SMALL_HW = 512               # hw at or below this -> channel-folded MXU path
_SMALL_LANE_CAP = 4096        # max folded lane extent (g * hw) for the small-HW path
_THW_CAP = 8192               # max lanes per reduction step in the multi-step path
_PER_BUF = 4 * 1024 * 1024    # streaming budget for ONE input buffer (double-buffered)
_CHUNK_GROUP = 8              # 128-lane chunks combined per accumulator read-modify-write


def _round_up(x, m):
    return ((x + m - 1) // m) * m


def _cdiv(a, b):
    return -(-a // b)


def _sublane(itemsize):
    # sublane packing of the 2nd-to-last dim: 8 (f32) / 16 (bf16) / 32 (int8/fp8)
    return max(8, 32 // max(1, itemsize))


def _tpu_info():
    """(vmem_capacity_bytes, tensorcores_per_device) with conservative fallbacks."""
    vmem_cap = 64 * 1024 * 1024
    cores = 0
    try:
        info = pltpu.get_tpu_info()
        vmem_cap = int(getattr(info, "vmem_capacity_bytes", vmem_cap))
        for attr in ("num_cores", "core_count", "num_tensorcores", "tensorcores"):
            v = getattr(info, attr, None)
            if v:
                cores = int(v)
                break
    except Exception:
        pass
    if cores <= 0:
        # v7x: 64 MiB VMEM per TensorCore, 2 TCs per chip; v5e/v6e: 128 MiB, 1 TC.
        cores = 2 if vmem_cap <= 96 * 1024 * 1024 else 1
    return vmem_cap, min(cores, 2)


# --------------------------------------------------------------------------------------
# Small-spatial path: channel-folded MXU segmented reduction
# --------------------------------------------------------------------------------------
def _small_hw_kernel(x_ref, w_ref, o_ref, *, inv_hw, precision):
    # (tr, g*hw) @ (g*hw, g) block-diagonal-ones matmul == per-segment sums, on the MXU.
    acc = jnp.dot(x_ref[...], w_ref[...],
                  preferred_element_type=jnp.float32, precision=precision)
    o_ref[...] = (acc * inv_hw).astype(o_ref.dtype)


def _small_hw_pool(x_flat, n, c, hw, itemsize, vmem_cap, n_cores):
    # Largest divisor g of C with g*hw within the lane cap.
    g = 1
    for d in range(1, c + 1):
        if c % d == 0 and d * hw <= _SMALL_LANE_CAP:
            g = d
    L = g * hw
    rows = n * (c // g)
    x2 = x_flat.reshape(rows, L)                                   # contiguous view
    ones_blkdiag = jnp.repeat(jnp.eye(g, dtype=x_flat.dtype), hw, axis=0)  # (L, g)

    lane_pad = _round_up(L, 128)
    if rows <= 8:
        tr = rows                                                  # full dim -> legal block
    else:
        budget_rows = max(8, (2 * 1024 * 1024) // max(1, lane_pad * itemsize))
        tr = min(rows, (budget_rows // 8) * 8)
        # Give every TensorCore at least ~2 row tiles when the row count allows it.
        while n_cores > 1 and tr > 8 and _cdiv(rows, tr) < 2 * n_cores:
            tr = max(8, ((tr - 1) // 8) * 8 if tr % 8 else tr - 8)
    grid = (_cdiv(rows, tr),)

    sub = _sublane(itemsize)
    in_blk = _round_up(tr, sub) * lane_pad * itemsize
    w_blk = lane_pad * _round_up(g, 128) * itemsize
    out_blk = _round_up(tr, sub) * _round_up(g, 128) * itemsize
    vmem_limit = int(1.5 * (2 * in_blk + 2 * w_blk + 2 * out_blk)) + (1 << 20)
    vmem_limit = max(4 << 20, min(vmem_limit, int(0.8 * vmem_cap)))

    precision = jax.lax.Precision.HIGHEST if itemsize >= 4 else None

    out = pl.pallas_call(
        functools.partial(_small_hw_kernel, inv_hw=1.0 / hw, precision=precision),
        out_shape=jax.ShapeDtypeStruct((rows, g), x_flat.dtype),
        grid_spec=pltpu.PrefetchScalarGridSpec(
            num_scalar_prefetch=0,
            grid=grid,
            in_specs=[
                pl.BlockSpec((tr, L), lambda i: (i, 0)),
                pl.BlockSpec((L, g), lambda i: (0, 0)),
            ],
            out_specs=pl.BlockSpec((tr, g), lambda i: (i, 0)),
        ),
        compiler_params=pltpu.CompilerParams(
            dimension_semantics=("parallel",),
            vmem_limit_bytes=vmem_limit,
        ),
        cost_estimate=pl.CostEstimate(
            flops=2 * rows * L * g,
            transcendentals=0,
            bytes_accessed=rows * L * itemsize + rows * g * itemsize + L * g * itemsize,
        ),
    )(x2, ones_blkdiag)
    return out.reshape(n, c)


# --------------------------------------------------------------------------------------
# Streaming path: tile choice
# --------------------------------------------------------------------------------------
def _choose_main_tiles(n, c, hw, itemsize, per_buf, single_budget, n_cores):
    sub = _sublane(itemsize)
    target = 2 * n_cores if n_cores > 1 else 1      # min parallel (N_t * C_t) grid steps

    def blk_bytes(tn, tc, thw):
        return tn * _round_up(tc, sub) * _round_up(thw, 128) * itemsize

    # Batch tile: one sublane group of rows, or the whole (small) batch.
    tn = n if n <= 8 else 8

    # Channel tile: whole C unless that blows the per-buffer budget or the batch axis
    # alone cannot feed every TensorCore.
    tc = c
    if c > 128:
        while tc > 128 and blk_bytes(tn, tc, 128) > per_buf:
            tc = max(128, _round_up(tc // 2, 128))
        if _cdiv(n, tn) < target and c >= 256:
            want_ct = _cdiv(target, _cdiv(n, tn))
            tc = min(tc, max(128, _round_up(_cdiv(c, want_ct), 128)))

    # Reduction tile.
    if blk_bytes(tn, tc, hw) <= single_budget:
        thw = hw                                    # whole reduction in one step
    else:
        cap = per_buf // max(1, tn * _round_up(tc, sub) * itemsize)
        cap = max(128, min(_THW_CAP, (cap // 128) * 128))
        # Prefer an exact divisor of H*W (no tail mask at all); else mask last step only.
        thw = next((d for d in range(cap, 127, -128) if hw % d == 0), cap)

    # Grow the batch tile into leftover streaming budget (multiples of 8), never
    # dropping the number of parallel steps below `target`.
    if n > tn:
        fit = (per_buf // max(1, blk_bytes(1, tc, thw))) // 8 * 8
        while fit > tn and _cdiv(n, fit) * _cdiv(c, tc) < target:
            fit -= 8
        if fit > tn:
            tn = min(n, fit)
    return tn, tc, thw


def _main_vmem_limit(tn, tc, thw, itemsize, multi, vmem_cap):
    sub = _sublane(itemsize)
    in_blk = tn * _round_up(tc, sub) * _round_up(thw, 128) * itemsize
    out_blk = _round_up(tn, sub) * _round_up(tc, 128) * itemsize
    acc_blk = tn * _round_up(tc, 8) * 128 * 4 if multi else 0
    limit = int(1.5 * (2 * in_blk + 2 * out_blk + acc_blk)) + (1 << 20)
    return max(4 << 20, min(limit, int(0.8 * vmem_cap)))


# --------------------------------------------------------------------------------------
# Streaming path: kernels
# --------------------------------------------------------------------------------------
def _gap_single_kernel(x_ref, o_ref, *, inv_hw):
    # Whole H*W in one block: sum (f32 accumulation), scale, cast. No scratch needed.
    o_ref[...] = (
        jnp.sum(x_ref[...], axis=-1, dtype=jnp.float32) * inv_hw
    ).astype(o_ref.dtype)


def _gap_multi_kernel(x_ref, o_ref, acc_ref, *, inv_hw, hw, thw, nk, need_mask):
    """Grid (N_t, C_t, HW_t); the last (HW) axis is the reduction axis.

    acc_ref: (tn, tc, 128) f32 per-lane partial sums.  The hot loop does only
    lane-wise VPU adds; the cross-lane 128->1 reduction (XLU) and the relayout to
    the (tn, tc) output happen once, in the finalize branch.
    """
    k = pl.program_id(2)
    nq = thw // 128

    @pl.when(k == 0)
    def _init():
        acc_ref[...] = jnp.zeros_like(acc_ref)

    def accumulate(tail):
        start0 = (nk - 1) * thw if tail else 0
        # Chunks holding at least one valid element (tail chunks past H*W are skipped
        # entirely at trace time; only the straddling chunk gets a mask).
        valid_nq = min(nq, _cdiv(hw - start0, 128)) if tail else nq
        for g0 in range(0, valid_nq, _CHUNK_GROUP):
            s = None
            for q in range(g0, min(g0 + _CHUNK_GROUP, valid_nq)):
                chunk = x_ref[:, :, q * 128:(q + 1) * 128]
                if tail:
                    lo = start0 + q * 128
                    if lo + 128 > hw:   # straddles the end of H*W -> mask it
                        col = jax.lax.broadcasted_iota(jnp.int32, chunk.shape, 2) + lo
                        chunk = jnp.where(col < hw, chunk, jnp.zeros_like(chunk))
                c32 = chunk.astype(jnp.float32)
                s = c32 if s is None else s + c32
            acc_ref[...] += s

    if need_mask:
        @pl.when(k < nk - 1)
        def _body():
            accumulate(False)

        @pl.when(k == nk - 1)
        def _tail():
            accumulate(True)
    else:
        accumulate(False)

    @pl.when(k == nk - 1)
    def _finalize():
        o_ref[...] = (jnp.sum(acc_ref[...], axis=-1) * inv_hw).astype(o_ref.dtype)


# --------------------------------------------------------------------------------------
# Public wrapper
# --------------------------------------------------------------------------------------
def global_avg_pool2d(x, *, _stream_buf_bytes=None, _single_step_bytes=None):
    """x: (N, C, H, W) -> (N, C) spatial mean (== adaptive_avg_pool2d(x, 1).view(N, -1)).

    The underscore-prefixed kwargs are test knobs that shrink the VMEM budgets so the
    multi-step / masked-tail paths can be exercised on small inputs.
    """
    n, c, h, w = x.shape
    hw = h * w
    x_flat = x.reshape(n, c, hw)
    itemsize = jnp.dtype(x.dtype).itemsize
    vmem_cap, n_cores = _tpu_info()

    if hw <= _SMALL_HW and _stream_buf_bytes is None and _single_step_bytes is None:
        return _small_hw_pool(x_flat, n, c, hw, itemsize, vmem_cap, n_cores)

    per_buf = int(_stream_buf_bytes) if _stream_buf_bytes else _PER_BUF
    if _single_step_bytes:
        single_budget = int(_single_step_bytes)
    else:
        single_budget = max(per_buf, vmem_cap // 8)

    tn, tc, thw = _choose_main_tiles(n, c, hw, itemsize, per_buf, single_budget, n_cores)

    inv_hw = 1.0 / hw
    cost = pl.CostEstimate(
        flops=n * c * hw,
        transcendentals=0,
        bytes_accessed=n * c * hw * itemsize + n * c * itemsize,
    )

    if thw >= hw:
        # Single reduction step: no accumulator scratch, no init/finalize branches.
        grid = (_cdiv(n, tn), _cdiv(c, tc))
        return pl.pallas_call(
            functools.partial(_gap_single_kernel, inv_hw=inv_hw),
            out_shape=jax.ShapeDtypeStruct((n, c), x.dtype),
            grid_spec=pltpu.PrefetchScalarGridSpec(
                num_scalar_prefetch=0,
                grid=grid,
                in_specs=[pl.BlockSpec((tn, tc, hw), lambda i, j: (i, j, 0))],
                out_specs=pl.BlockSpec((tn, tc), lambda i, j: (i, j)),
            ),
            compiler_params=pltpu.CompilerParams(
                dimension_semantics=("parallel", "parallel"),
                vmem_limit_bytes=_main_vmem_limit(tn, tc, hw, itemsize, False, vmem_cap),
            ),
            cost_estimate=cost,
        )(x_flat)

    nk = _cdiv(hw, thw)
    need_mask = (hw % thw) != 0
    grid = (_cdiv(n, tn), _cdiv(c, tc), nk)
    return pl.pallas_call(
        functools.partial(_gap_multi_kernel, inv_hw=inv_hw, hw=hw, thw=thw,
                          nk=nk, need_mask=need_mask),
        out_shape=jax.ShapeDtypeStruct((n, c), x.dtype),
        grid_spec=pltpu.PrefetchScalarGridSpec(
            num_scalar_prefetch=0,
            grid=grid,
            in_specs=[pl.BlockSpec((tn, tc, thw), lambda i, j, k: (i, j, k))],
            out_specs=pl.BlockSpec((tn, tc), lambda i, j, k: (i, j)),
            scratch_shapes=[pltpu.VMEM((tn, tc, 128), jnp.float32)],
        ),
        compiler_params=pltpu.CompilerParams(
            dimension_semantics=("parallel", "parallel", "arbitrary"),
            vmem_limit_bytes=_main_vmem_limit(tn, tc, thw, itemsize, True, vmem_cap),
        ),
        cost_estimate=cost,
    )(x_flat)


if __name__ == "__main__":
    # 1) Module-consistent small shape -> small-spatial (channel-folded MXU) path.
    x1 = jax.random.normal(jax.random.PRNGKey(0), (2, 4, 16, 16), dtype=jnp.float32)
    out1 = global_avg_pool2d(x1)
    jax.block_until_ready(out1)
    ref1 = jnp.mean(x1, axis=(2, 3))
    assert out1.shape == (2, 4), out1.shape
    assert jnp.allclose(out1, ref1, atol=1e-5, rtol=1e-5), \
        float(jnp.max(jnp.abs(out1 - ref1)))

    # 2) Single-step streaming reduction path.
    x2 = jax.random.normal(jax.random.PRNGKey(1), (2, 8, 80, 80), dtype=jnp.float32)
    out2 = global_avg_pool2d(x2)
    jax.block_until_ready(out2)
    ref2 = jnp.mean(x2, axis=(2, 3))
    assert out2.shape == (2, 8), out2.shape
    assert jnp.allclose(out2, ref2, atol=1e-5, rtol=1e-5), \
        float(jnp.max(jnp.abs(out2 - ref2)))

    # 3) Multi-step reduction with a masked tail (H*W = 1221 has no multiple-of-128
    #    divisor); small VMEM budgets force the tiled path on a small input.
    x3 = jax.random.normal(jax.random.PRNGKey(2), (2, 8, 33, 37), dtype=jnp.float32)
    out3 = global_avg_pool2d(x3, _stream_buf_bytes=65536, _single_step_bytes=65536)
    jax.block_until_ready(out3)
    ref3 = jnp.mean(x3, axis=(2, 3))
    assert out3.shape == (2, 8), out3.shape
    assert jnp.allclose(out3, ref3, atol=1e-5, rtol=1e-5), \
        float(jnp.max(jnp.abs(out3 - ref3)))

    print("KERNEL_OK")
</pallas_src>

<mosaic_0001>
module attributes {stable_mosaic.version = 11 : i64} {
  func.func @_small_hw_kernel(%arg0: i32, %arg1: memref<2x1024xf32, #tpu.memory_space<vmem>>, %arg2: memref<1024x4xf32, #tpu.memory_space<vmem>>, %arg3: memref<2x4xf32, #tpu.memory_space<vmem>>) attributes {dimension_semantics = [#tpu.dimension_semantics<parallel>], iteration_bounds = array<i64: 1>, scalar_prefetch = 0 : i64, scratch_operands = 0 : i64, tpu.core_type = #tpu.core_type<tc>, window_params = [{transform_indices = @transform_0, window_bounds = array<i64: 2, 1024>}, {pipeline_mode = #tpu.pipeline_mode<synchronous>, transform_indices = @transform_1, window_bounds = array<i64: 1024, 4>}, {transform_indices = @transform_2, window_bounds = array<i64: 2, 4>}]} {
    %c0 = arith.constant 0 : index
    %c0_0 = arith.constant 0 : index
    %0 = vector.load %arg1[%c0, %c0_0] : memref<2x1024xf32, #tpu.memory_space<vmem>>, vector<2x1024xf32>
    %c0_1 = arith.constant 0 : index
    %c0_2 = arith.constant 0 : index
    %1 = vector.load %arg2[%c0_1, %c0_2] : memref<1024x4xf32, #tpu.memory_space<vmem>>, vector<1024x4xf32>
    %cst = arith.constant dense<0.000000e+00> : vector<2x4xf32>
    %2 = tpu.matmul %0, %1, %cst {dimension_numbers = #tpu.dot_dimension_numbers<[1], [0], [0], [1], [0, 0, 1, 1], [], []>, precision = #tpu.contract_precision<fp32>} : vector<2x1024xf32>, vector<1024x4xf32>, vector<2x4xf32> -> vector<2x4xf32>
    %cst_3 = arith.constant 3.906250e-03 : f32
    %3 = vector.broadcast %cst_3 : f32 to vector<2x4xf32>
    %4 = arith.mulf %2, %3 : vector<2x4xf32>
    %c0_4 = arith.constant 0 : index
    %c0_5 = arith.constant 0 : index
    %5 = vector.load %arg3[%c0_4, %c0_5] : memref<2x4xf32, #tpu.memory_space<vmem>>, vector<2x4xf32>
    tpu.vector_store %arg3[%c0_4, %c0_5], %4 {strides = array<i32>} : memref<2x4xf32, #tpu.memory_space<vmem>>, vector<2x4xf32>,
    return
  }
  func.func @transform_0(%arg0: i32) -> (i32, i32) {
    %c0_i32 = arith.constant 0 : i32
    %c0_i32_0 = arith.constant 0 : i32
    return %arg0, %c0_i32 : i32, i32
  }
  func.func @transform_1(%arg0: i32) -> (i32, i32) {
    %c0_i32 = arith.constant 0 : i32
    %c0_i32_0 = arith.constant 0 : i32
    %c0_i32_1 = arith.constant 0 : i32
    return %c0_i32, %c0_i32_0 : i32, i32
  }
  func.func @transform_2(%arg0: i32) -> (i32, i32) {
    %c0_i32 = arith.constant 0 : i32
    %c0_i32_0 = arith.constant 0 : i32
    return %arg0, %c0_i32 : i32, i32
  }
}

</mosaic_0001>

<bundles_post_ra>
// kernel: tpu_custom_call.1
= control target key start
LH: loop header
LB: loop body
LE: loop exit
PB: predicated region body
PF: predicated region fallthrough
CT: control target
= control target key end

     0   :  { %v4517_v16 = vmov 1983009808   ;;  %s7337_s0 = inlined_call_operand.vmem [shape: f32[2,1024], index: 0, kind: input, shape index: {}]   ;;  %s7338_s1 = inlined_call_operand.vmem [shape: f32[1024,4], index: 1, kind: input, shape index: {}]   ;;  %s7339_s2 = inlined_call_operand.hbm [shape: f32[2,4], index: 2, kind: output, shape index: {}]  }
   0x1   :  { %v45_v0 = vld [vmem:[%s7338_s1 + $0xf8] sm:$0xff]  ;;  %v44_v2 = vld [vmem:[%s7338_s1 + $0xf0] sm:$0xff]  ;;  %v43_v7 = vld [vmem:[%s7338_s1 + $0xe8] sm:$0xff]  ;;  %v4575_v17 = vunpack.c.l.s4 %v4517_v16 }
   0x2   :  { %v29_v1 = vld [vmem:[%s7338_s1 + $0x78] sm:$0xff]  ;;  %v4543_v3 = vand.u32 4294901760, %v45_v0  ;;  %v4547_v5 = vand.u32 4294901760, %v44_v2  ;;  %v28_v6 = vld [vmem:[%s7338_s1 + $0x70] sm:$0xff]  ;;  %v27_v8 = vld [vmem:[%s7338_s1 + $0x68] sm:$0xff]  ;;  %v4560_v11 = vand.u32 4294901760, %v43_v7 }
   0x3   :  { %v4545_v4 = vand.u32 4294901760, %v29_v1  ;;  %v4558_v10 = vand.u32 4294901760, %v28_v6  ;;  %v4562_v12 = vand.u32 4294901760, %v27_v8  ;;  %v42_v13 = vld [vmem:[%s7338_s1 + $0xe0] sm:$0xff]  ;;  %v4573_v15 = vld [vmem:[%s7338_s1 + $0xd8] sm:$0xff]  ;;  %v4596_v23 = vld [vmem:[%s7338_s1 + $0xd0] sm:$0xff] }
   0x4   :  { %v26_v14 = vld [vmem:[%s7338_s1 + $0x60] sm:$0xff]  ;;  %3651 = vmatprep.subr.mxu0 %v4543_v3  ;;  %v4578_v18 = vand.u32 4294901760, %v42_v13  ;;  %v4583_v20 = vand.u32 4294901760, %v4573_v15  ;;  %v4586_v21 = vsub.f32 %v45_v0, %v4543_v3  ;;  %v4591_v22 = vld [vmem:[%s7338_s1 + $0x58] sm:$0xff]  ;;  %v4601_v24 = vld [vmem:[%s7338_s1 + $0x50] sm:$0xff]  ;;  %v4611_v27 = vand.u32 4294901760, %v4596_v23 }
   0x5   :  { %v4580_v19 = vand.u32 4294901760, %v26_v14  ;;  %3652 = vmatpush3.msra.mxu0 %v4545_v4  ;;  %v4605_v25 = vand.u32 4294901760, %v4591_v22  ;;  %v4608_v26 = vsub.f32 %v29_v1, %v4545_v4  ;;  %v4614_v28 = vsub.f32 %v44_v2, %v4547_v5  ;;  %v4619_v29 = vld [vmem:[%s7338_s1 + $0xc8] sm:$0xff]  ;;  %v4629_v31 = vld [vmem:[%s7338_s1 + $0xc0] sm:$0xff]  ;;  %v4681_v49 = vld [vmem:[%s7338_s1 + $0xb8] sm:$0xff] }
   0x6   :  { %7623 = vst [vmem:[#allocation5_spill] sm:$0xff] %v4586_v21  ;;  %v4624_v30 = vld [vmem:[%s7338_s1 + $0x48] sm:$0xff]  ;;  %3653 = vmatprep.subr.mxu0 %v4547_v5  ;;  %v7352_v32 = vand.u32 4294901760, %v4586_v21  ;;  %v4634_v33 = vand.u32 4294901760, %v4601_v24  ;;  %v4637_v34 = vsub.f32 %v28_v6, %v4558_v10  ;;  %v4640_v35 = vand.u32 4294901760, %v4619_v29  ;;  %v4654_v40 = vld [vmem:[%s7338_s1 + $0x40] sm:$0xff] }
   0x7   :  { %3654 = vmatpush3.msra.mxu0 %v4558_v10  ;;  %v7351_v36 = vand.u32 4294901760, %v4608_v26  ;;  %v7349_v37 = vand.u32 4294901760, %v4614_v28  ;;  %v4646_v38 = vsub.f32 %v43_v7, %v4560_v11  ;;  %v4649_v39 = vand.u32 4294901760, %v4624_v30  ;;  %v4694_v54 = vld [vmem:[%s7338_s1 + $0x38] sm:$0xff]  ;;  %v4704_v59 = vld [vmem:[%s7338_s1 + $0xb0] sm:$0xff]  ;;  %v4871_v9 = vld [vmem:[%s7338_s1 + $0x88] sm:$0xff] }
   0x8   :  { %3655 = vmatprep.subr.mxu0 %v4560_v11  ;;  %v414_v41 = vsub.f32 %v4586_v21, %v7352_v32  ;;  %v7347_v42 = vand.u32 4294901760, %v4637_v34  ;;  %v4662_v43 = vsub.f32 %v27_v8, %v4562_v12  ;;  %v4665_v44 = vand.u32 4294901760, %v4629_v31  ;;  %v4719_v0 = vld [vmem:[%s7338_s1 + $0x30] sm:$0xff]  ;;  %v4735_v8 = vld [vmem:[%s7338_s1 + $0xa8] sm:$0xff] }
   0x9   :  { %3656 = vmatpush3.msra.mxu0 %v4562_v12  ;;  %v302_v45 = vsub.f32 %v4608_v26, %v7351_v36  ;;  %v421_v46 = vsub.f32 %v4614_v28, %v7349_v37  ;;  %v7346_v47 = vand.u32 4294901760, %v4646_v38  ;;  %v4676_v48 = vsub.f32 %v42_v13, %v4578_v18  ;;  %v4844_v37 = vld [vmem:[%s7338_s1 + $0x90] sm:$0xff] }
   0xa   :  { %7624 = vst [vmem:[#allocation6_spill] sm:$0xff] %v4665_v44  ;;  %3657 = vmatprep.subr.mxu0 %v4578_v18  ;;  %v415_v50 = vand.u32 4294901760, %v414_v41  ;;  %v309_v51 = vsub.f32 %v4637_v34, %v7347_v42  ;;  %v7344_v52 = vand.u32 4294901760, %v4662_v43  ;;  %v4689_v53 = vand.u32 4294901760, %v4654_v40  ;;  %v4749_v41 = vld [vmem:[%s7338_s1 + $0x28] sm:$0xff]  ;;  %v4828_v42 = vld [vmem:[%s7338_s1 + $0x18] sm:$0xff] }
   0xb   :  { %3658 = vmatpush3.msra.mxu0 %v4580_v19  ;;  %v303_v55 = vand.u32 4294901760, %v302_v45  ;;  %v422_v56 = vand.u32 4294901760, %v421_v46  ;;  %v428_v57 = vsub.f32 %v4646_v38, %v7346_v47  ;;  %v7342_v58 = vand.u32 4294901760, %v4676_v48 }
   0xc   :  { %7625 = vst [vmem:[#allocation7_spill] sm:$0xff] %v4689_v53  ;;  %3659 = vmatprep.subr.mxu0 %v4583_v20  ;;  %3686 = vmatprep.subr.mxu1 %v415_v50  ;;  %v310_v60 = vand.u32 4294901760, %v309_v51  ;;  %v316_v61 = vsub.f32 %v4662_v43, %v7344_v52  ;;  %v4711_v62 = vsub.f32 %v26_v14, %v4580_v19  ;;  %v4714_v63 = vand.u32 4294901760, %v4681_v49 }
   0xd   :  { %3660 = vmatpush3.msra.mxu0 %v4605_v25  ;;  %3687 = vmatpush3.msra.mxu1 %v303_v55  ;;  %v429_v1 = vand.u32 4294901760, %v428_v57  ;;  %v435_v2 = vsub.f32 %v4676_v48, %v7342_v58  ;;  %v4727_v6 = vsub.f32 %v4573_v15, %v4583_v20  ;;  %v4730_v7 = vand.u32 4294901760, %v4694_v54 }
   0xe   :  { %7626 = vst [vmem:[#allocation8_spill] sm:$0xff] %v4714_v63  ;;  %3661 = vmatprep.subr.mxu0 %v4611_v27  ;;  %3688 = vmatprep.subr.mxu1 %v422_v56  ;;  %v317_v13 = vand.u32 4294901760, %v316_v61  ;;  %v7340_v14 = vand.u32 4294901760, %v4711_v62  ;;  %v4741_v16 = vsub.f32 %v4591_v22, %v4605_v25  ;;  %v4744_v15 = vand.u32 4294901760, %v4704_v59 }
   0xf   :  { %7627 = vst [vmem:[#allocation9_spill] sm:$0xff] %v4730_v7  ;;  %3662 = vmatpush3.msra.mxu0 %v4634_v33  ;;  %3689 = vmatpush3.msra.mxu1 %v310_v60  ;;  %v436_v45 = vand.u32 4294901760, %v435_v2  ;;  %v7341_v46 = vand.u32 4294901760, %v4727_v6  ;;  %v4755_v50 = vsub.f32 %v4596_v23, %v4611_v27  ;;  %v4758_v22 = vand.u32 4294901760, %v4719_v0  ;;  %v4775_v23 = vld [vmem:[%s7338_s1 + $0xa0] sm:$0xff] }
  0x10   :  { %7628 = vst [vmem:[#allocation10_spill] sm:$0xff] %v4744_v15  ;;  %3663 = vmatprep.subr.mxu0 %v4640_v35  ;;  %3690 = vmatprep.subr.mxu1 %v429_v1  ;;  %v323_v51 = vsub.f32 %v4711_v62, %v7340_v14  ;;  %v7343_v55 = vand.u32 4294901760, %v4741_v16  ;;  %v4767_v56 = vsub.f32 %v4601_v24, %v4634_v33  ;;  %v4770_v57 = vand.u32 4294901760, %v4735_v8 }
  0x11   :  { %7629 = vst [vmem:[#allocation11_spill] sm:$0xff] %v4758_v22  ;;  %3664 = vmatpush3.msra.mxu0 %v4649_v39  ;;  %3691 = vmatpush3.msra.mxu1 %v317_v13  ;;  %v442_v60 = vsub.f32 %v4727_v6, %v7341_v46  ;;  %v7345_v61 = vand.u32 4294901760, %v4755_v50  ;;  %v4784_v24 = vsub.f32 %v4619_v29, %v4640_v35  ;;  %v4787_v1 = vand.u32 4294901760, %v4749_v41  ;;  %v4801_v29 = vld [vmem:[%s7338_s1 + $0x20] sm:$0xff] }
  0x12   :  { %7630 = vst [vmem:[#allocation12_spill] sm:$0xff] %v4770_v57  ;;  %3665 = vmatprep.subr.mxu0 %v4665_v44  ;;  %3692 = vmatprep.subr.mxu1 %v436_v45  ;;  %v324_v2 = vand.u32 4294901760, %v323_v51  ;;  %v330_v13 = vsub.f32 %v4741_v16, %v7343_v55  ;;  %v7348_v14 = vand.u32 4294901760, %v4767_v56  ;;  %v4796_v46 = vsub.f32 %v4624_v30, %v4649_v39  ;;  %v4814_v30 = vld [vmem:[%s7338_s1 + $0x98] sm:$0xff] }
  0x13   :  { %7631 = vst [vmem:[#allocation13_spill] sm:$0xff] %v4787_v1  ;;  %3666 = vmatpush3.msra.mxu0 %v4689_v53  ;;  %v443_v58 = vand.u32 4294901760, %v442_v60  ;;  %v449_v45 = vsub.f32 %v4755_v50, %v7345_v61  ;;  %v7350_v51 = vand.u32 4294901760, %v4784_v24  ;;  %v4809_v55 = vand.u32 4294901760, %v4775_v23 }
  0x14   :  { %3693 = vmatpush3.msra.mxu1 %v324_v2  ;;  %3667 = vmatprep.subr.mxu0 %v4714_v63  ;;  %v331_v52 = vand.u32 4294901760, %v330_v13  ;;  %v337_v60 = vsub.f32 %v4767_v56, %v7348_v14  ;;  %v7353_v61 = vand.u32 4294901760, %v4796_v46  ;;  %v4823_v47 = vsub.f32 %v4629_v31, %v4665_v44 }
  0x15   :  { %7632 = vst [vmem:[#allocation14_spill] sm:$0xff] %v4809_v55  ;;  %3694 = vmatprep.subr.mxu1 %v443_v58  ;;  %3668 = vmatpush3.msra.mxu0 %v4730_v7  ;;  %v450_v2 = vand.u32 4294901760, %v449_v45  ;;  %v456_v13 = vsub.f32 %v4784_v24, %v7350_v51  ;;  %v4835_v14 = vand.u32 4294901760, %v4801_v29  ;;  %v4839_v31 = vsub.f32 %v4654_v40, %v4689_v53  ;;  %v4857_v40 = vld [vmem:[%s7338_s1 + $0x10] sm:$0xff] }
  0x16   :  { %3695 = vmatpush3.msra.mxu1 %v331_v52  ;;  %3669 = vmatprep.subr.mxu0 %v4744_v15  ;;  %v338_v58 = vand.u32 4294901760, %v337_v60  ;;  %v344_v45 = vsub.f32 %v4796_v46, %v7353_v61  ;;  %v7358_v51 = vand.u32 4294901760, %v4823_v47  ;;  %v4852_v36 = vand.u32 4294901760, %v4814_v30 }
  0x17   :  { %7633 = vst [vmem:[#allocation15_spill] sm:$0xff] %v4835_v14  ;;  %7634 = vst [vmem:[#allocation16_spill] sm:$0xff] %v4839_v31  ;;  %3696 = vmatprep.subr.mxu1 %v450_v2  ;;  %3670 = vmatpush3.msra.mxu0 %v4758_v22  ;;  %v457_v52 = vand.u32 4294901760, %v456_v13  ;;  %v4863_v32 = vsub.f32 %v4681_v49, %v4714_v63  ;;  %v4866_v61 = vand.u32 4294901760, %v4828_v42 }
  0x18   :  { %7635 = vst [vmem:[#allocation17_spill] sm:$0xff] %v4852_v36 }
  0x19   :  { %7636 = vst [vmem:[#allocation18_spill] sm:$0xff] %v4866_v61 }
  0x1a   :  { %7 = vsyncpa [#allocation3], 0  ;;  %3697 = vmatpush3.msra.mxu1 %v338_v58  ;;  %3671 = vmatprep.subr.mxu0 %v4770_v57  ;;  %v345_v2 = vand.u32 4294901760, %v344_v45  ;;  %v463_v13 = vsub.f32 %v4823_v47, %v7358_v51  ;;  %v4879_v49 = vsub.f32 %v4694_v54, %v4730_v7  ;;  %v4882_v60 = vand.u32 4294901760, %v4844_v37  ;;  %v4899_v54 = vld [vmem:[%s7338_s1 + $0x8] sm:$0xff] }
  0x1b   :  { %3698 = vmatprep.subr.mxu1 %v457_v52  ;;  %3672 = vmatpush3.msra.mxu0 %v4787_v1  ;;  %v7639_v63 = vand.u32 4294901760, %v4839_v31  ;;  %v4891_v53 = vsub.f32 %v4704_v59, %v4744_v15  ;;  %v4894_v51 = vand.u32 4294901760, %v4857_v40  ;;  %v4905_v45 = vsub.f32 %v4719_v0, %v4758_v22  ;;  %v4913_v15 = vld [vmem:[%s7338_s1 + $0x80] sm:$0xff] }
  0x1c   :  { %7637 = vst [vmem:[#allocation19_spill] sm:$0xff] %v4879_v49  ;;  %7638 = vst [vmem:[#allocation20_spill] sm:$0xff] %v4882_v60  ;;  %3699 = vmatpush3.msra.mxu1 %v345_v2  ;;  %3673 = vmatprep.subr.mxu0 %v4809_v55  ;;  %v464_v52 = vand.u32 4294901760, %v463_v13  ;;  %v4908_v59 = vand.u32 4294901760, %v4871_v9  ;;  %v7643_v7 = vand.u32 4294901760, %v4863_v32  ;;  %v4922_v0 = vsub.f32 %v4735_v8, %v4770_v57  ;;  %v4939_v8 = vld [vmem:[%s7338_s1] sm:$0xff] }
  0x1d   :  { %v351_v58 = vsub.f32 %v4839_v31, %v7639_v63  ;;  %7640 = vst [vmem:[#allocation21_spill] sm:$0xff] %v4891_v53  ;;  %7641 = vst [vmem:[#allocation22_spill] sm:$0xff] %v4894_v51  ;;  %3674 = vmatpush3.msra.mxu0 %v4835_v14  ;;  %v7375_v63 = vand.u32 4294901760, %v4891_v53  ;;  %v7645_v22 = vand.u32 4294901760, %v4879_v49  ;;  %v4947_v57 = vand.u32 4294901760, %v4913_v15 }
  0x1e   :  { %7642 = vst [vmem:[#allocation23_spill] sm:$0xff] %v4908_v59  ;;  %v470_v13 = vsub.f32 %v4863_v32, %v7643_v7  ;;  %7644 = vst [vmem:[#allocation24_spill] sm:$0xff] %v4922_v0  ;;  %3700 = vmatprep.subr.mxu1 %v464_v52  ;;  %3675 = vmatprep.subr.mxu0 %v4852_v36  ;;  %v4934_v7 = vsub.f32 %v4749_v41, %v4787_v1  ;;  %v7380_v31 = vand.u32 4294901760, %v4922_v0  ;;  %vm3635_vm0 = vcmask 25600  }
  0x1f   :  { %v352_v2 = vand.u32 4294901760, %v351_v58  ;;  %v358_v44 = vsub.f32 %v4879_v49, %v7645_v22  ;;  %v4930_v58 = vand.u32 4294901760, %v4899_v54  ;;  %3676 = vmatpush3.msra.mxu0 %v4866_v61  ;;  %v477_v22 = vsub.f32 %v4891_v53, %v7375_v63 }
  0x20   :  { %v471_v52 = vand.u32 4294901760, %v470_v13  ;;  %3677 = vmatprep.subr.mxu0 %v4882_v60  ;;  %v7647_v1 = vand.u32 4294901760, %v4905_v45  ;;  %v4956_v13 = vsub.f32 %v4775_v23, %v4809_v55  ;;  %v4963_v53 = vand.u32 4294901760, %v4939_v8 }
  0x21   :  { %7646 = vst [vmem:[#allocation25_spill] sm:$0xff] %v4930_v58  ;;  %3701 = vmatpush3.msra.mxu1 %v352_v2  ;;  %v359_v41 = vand.u32 4294901760, %v358_v44  ;;  %v478_v63 = vand.u32 4294901760, %v477_v22  ;;  %3678 = vmatpush3.msra.mxu0 %v4894_v51  ;;  %v484_v44 = vsub.f32 %v4922_v0, %v7380_v31  ;;  %v7649_v23 = vand.u32 4294901760, %v4934_v7 }
  0x22   :  { %v365_v49 = vsub.f32 %v4905_v45, %v7647_v1  ;;  %3702 = vmatprep.subr.mxu1 %v471_v52  ;;  %7648 = vst [vmem:[#allocation26_spill] sm:$0xff] %v4963_v53  ;;  %v4967_v1 = vsub.f32 %v4801_v29, %v4835_v14  ;;  %3679 = vmatprep.subr.mxu0 %v4908_v59  ;;  %v7385_v22 = vand.u32 4294901760, %v4956_v13  ;;  %v147_v0 = vunpack.c.0.s8 %v4575_v17 }
  0x23   :  { %3703 = vmatpush3.msra.mxu1 %v359_v41  ;;  %v372_v52 = vsub.f32 %v4934_v7, %v7649_v23  ;;  %v485_v55 = vand.u32 4294901760, %v484_v44  ;;  %3680 = vmatpush3.msra.mxu0 %v4930_v58  ;;  %v7650_v29 = vlaneseq  ;;  %v4989_v44 = vsub.f32 %v4814_v30, %v4852_v36 }
  0x24   :  { %v366_v2 = vand.u32 4294901760, %v365_v49  ;;  %3704 = vmatprep.subr.mxu1 %v478_v63  ;;  %v7386_v31 = vand.u32 4294901760, %v4967_v1  ;;  %3681 = vmatprep.subr.mxu0 %v4947_v57  ;;  %v491_v41 = vsub.f32 %v4956_v13, %v7385_v22  ;;  %v4985_v63 = vld [vmem:[%s7337_s0] sm:$0xff]  ;;  %v4993_v17 = vsub.f32 %v4828_v42, %v4866_v61 }
  0x25   :  { %v149_v14 = vshrl.u32 %v7650_v29, 7  ;;  %v373_v49 = vand.u32 4294901760, %v372_v52  ;;  %7651 = vst [vmem:[#allocation27_spill] sm:$0xff] %v4985_v63  ;;  %3682 = vmatpush3.msra.mxu0 %v4963_v53  ;;  %v5003_v52 = vsub.f32 %v4844_v37, %v4882_v60  ;;  %v7387_v29 = vand.u32 4294901760, %v4989_v44 }
  0x26   :  { %3705 = vmatpush3.msra.mxu1 %v366_v2  ;;  %v379_v2 = vsub.f32 %v4967_v1, %v7386_v31  ;;  %v492_v30 = vand.u32 4294901760, %v491_v41  ;;  %3721 = vmatprep.subr.mxu0 %v4586_v21  ;;  %v7392_v42 = vand.u32 4294901760, %v4993_v17  ;;  %v5017_v37 = vsub.f32 %v4871_v9, %v4908_v59 }
  0x27   :  { %3706 = vmatprep.subr.mxu1 %v485_v55  ;;  %v4999_v23 = vsub.s32 %v147_v0, %v149_v14  ;;  %v5010_v55 = vsub.f32 %v4857_v40, %v4894_v51  ;;  %v7654_v9 = vand.u32 4294901760, %v5003_v52 }
  0x28   :  { %3707 = vmatpush3.msra.mxu1 %v373_v49  ;;  %v380_v22 = vand.u32 4294901760, %v379_v2  ;;  %v498_v49 = vsub.f32 %v4989_v44, %v7387_v29  ;;  %v386_v40 = vsub.f32 %v4993_v17, %v7392_v42  ;;  %v5028_v2 = vsub.f32 %v4899_v54, %v4930_v58 }
  0x29   :  { %7652 = vst [vmem:[#allocation28_spill] sm:$0xff] %v4999_v23  ;;  %v151_v14 = vrot.slane %v4985_v63, %v4999_v23  ;;  %3708 = vmatprep.subr.mxu1 %v492_v30  ;;  %v7398_v41 = vand.u32 4294901760, %v5010_v55  ;;  %v505_v30 = vsub.f32 %v5003_v52, %v7654_v9  ;;  %v7400_v29 = vand.u32 4294901760, %v5017_v37 }
  0x2a   :  { %3709 = vmatpush3.msra.mxu1 %v380_v22  ;;  %v499_v23 = vand.u32 4294901760, %v498_v49  ;;  %v387_v63 = vand.u32 4294901760, %v386_v40  ;;  %v7399_v21 = vand.u32 4294901760, %v5028_v2  ;;  %v5053_v40 = vsub.f32 %v4913_v15, %v4947_v57 }
  0x2b   :  { %v159_v31 = vcombine.high %v151_v14, %v151_v14  ;;  %v5030_v0 = vand.u32 4294901760, %v151_v14  ;;  %v393_v42 = vsub.f32 %v5010_v55, %v7398_v41  ;;  %v506_v58 = vand.u32 4294901760, %v505_v30 }
  0x2c   :  { %v512_v9 = vsub.f32 %v5017_v37, %v7400_v29  ;;  %3710 = vmatprep.subr.mxu1 %v499_v23  ;;  %v400_v49 = vsub.f32 %v5028_v2, %v7399_v21  ;;  %v5057_v41 = vsub.f32 %v4939_v8, %v4963_v53  ;;  %v7406_v21 = vand.u32 4294901760, %v5053_v40 }
  0x2d   :  { %7653 = vst [vmem:[#allocation29_spill] sm:$0xff] %v5030_v0  ;;  %v5040_v54 = vand.u32 4294901760, %v159_v31  ;;  %v5043_v22 = vsub.f32 %v151_v14, %v5030_v0  ;;  %v394_v59 = vand.u32 4294901760, %v393_v42  ;;  %3711 = vmatpush3.msra.mxu1 %v387_v63 }
  0x2e   :  { %7656 = vst [vmem:[#allocation31_spill] sm:$0xff] %v5057_v41  ;;  %v513_v23 = vand.u32 4294901760, %v512_v9  ;;  %3712 = vmatprep.subr.mxu1 %v506_v58  ;;  %v401_v42 = vand.u32 4294901760, %v400_v49  ;;  %v7405_v15 = vand.u32 4294901760, %v5057_v41 }
  0x2f   :  { %7655 = vst [vmem:[#allocation30_spill] sm:$0xff] %v5040_v54  ;;  %v5060_v14 = vsub.f32 %v159_v31, %v5040_v54  ;;  %v7407_v30 = vand.u32 4294901760, %v5043_v22  ;;  %523 = vmatprep.mubr.f32.mxu1 %v5040_v54  ;;  %3713 = vmatpush3.msra.mxu1 %v394_v59  ;;  %v519_v31 = vsub.f32 %v5053_v40, %v7406_v21  ;;  %v7658_v59 = vld [vmem:[#allocation6_spill] sm:$0xff] }
  0x30   :  { %3714 = vmatprep.subr.mxu1 %v513_v23  ;;  %v407_v58 = vsub.f32 %v5057_v41, %v7405_v15  ;;  %v7660_v23 = vld [vmem:[#allocation19_spill] sm:$0xff]  ;;  %v7668_v15 = vld [vmem:[#allocation13_spill] sm:$0xff]  ;;  %v7669_v21 = vld [vmem:[#allocation14_spill] sm:$0xff] }
  0x31   :  { %v7408_v29 = vand.u32 4294901760, %v5060_v14  ;;  %v291_v8 = vsub.f32 %v5043_v22, %v7407_v30  ;;  %3715 = vmatpush3.msra.mxu1 %v401_v42  ;;  %v520_v49 = vand.u32 4294901760, %v519_v31  ;;  %v7661_v42 = vld [vmem:[#allocation8_spill] sm:$0xff]  ;;  %v7663_v31 = vld [vmem:[#allocation9_spill] sm:$0xff]  ;;  %v7670_v30 = vld [vmem:[#allocation15_spill] sm:$0xff] }
  0x32   :  { %v408_v54 = vand.u32 4294901760, %v407_v58  ;;  %v7664_v58 = vld [vmem:[#allocation10_spill] sm:$0xff] }
  0x33   :  { %v285_v63 = vsub.f32 %v5060_v14, %v7408_v29  ;;  %v292_v9 = vand.u32 4294901760, %v291_v8  ;;  %3716 = vmatprep.subr.mxu1 %v520_v49  ;;  %v7662_v8 = vld [vmem:[#allocation21_spill] sm:$0xff]  ;;  %v7667_v49 = vld [vmem:[#allocation12_spill] sm:$0xff]  ;;  %v7671_v29 = vld [vmem:[#allocation23_spill] sm:$0xff] }
  0x34   :  { %3717 = vmatpush3.msra.mxu1 %v408_v54  ;;  %v7659_v54 = vld [vmem:[#allocation7_spill] sm:$0xff] }
  0x35   :  { %v286_v53 = vand.u32 4294901760, %v285_v63  ;;  %525 = vmatmul.mubr.f32.vlgmr.msra.gmra.mxu1 %v5030_v0  ;;  %3756 = vmatprep.subr.mxu1 %v4543_v3  ;;  %v7665_v63 = vld [vmem:[#allocation24_spill] sm:$0xff]  ;;  %v7672_v0 = vld [vmem:[#allocation25_spill] sm:$0xff] }
  0x36   :  { %3757 = vmatpush3.msra.mxu1 %v4545_v4 }
  0x37   :  { %287 = vmatprep.mubr.f32.mxu0 %v286_v53  ;;  %3758 = vmatprep.subr.mxu1 %v4547_v5  ;;  %v7657_v53 = vld [vmem:[#allocation16_spill] sm:$0xff] }
  0x38   :  { %293 = vmatmul.mubr.f32.vlgmr.msra.gmra.mxu0 %v292_v9  ;;  %3759 = vmatpush3.msra.mxu1 %v4558_v10  ;;  %v7666_v9 = vld [vmem:[#allocation11_spill] sm:$0xff] }
  0x39   :  { %3722 = vmatpush3.msra.mxu0 %v4608_v26  ;;  %3760 = vmatprep.subr.mxu1 %v4560_v11 }
  0x3a   :  { %3723 = vmatprep.subr.mxu0 %v4614_v28  ;;  %3761 = vmatpush3.msra.mxu1 %v4562_v12 }
  0x3b   :  { %3724 = vmatpush3.msra.mxu0 %v4637_v34  ;;  %3762 = vmatprep.subr.mxu1 %v4578_v18 }
  0x3c   :  { %3725 = vmatprep.subr.mxu0 %v4646_v38  ;;  %3763 = vmatpush3.msra.mxu1 %v4580_v19 }
  0x3d   :  { %3726 = vmatpush3.msra.mxu0 %v4662_v43  ;;  %3764 = vmatprep.subr.mxu1 %v4583_v20 }
  0x3e   :  { %3727 = vmatprep.subr.mxu0 %v4676_v48  ;;  %3765 = vmatpush3.msra.mxu1 %v4605_v25 }
  0x3f   :  { %3728 = vmatpush3.msra.mxu0 %v4711_v62  ;;  %3766 = vmatprep.subr.mxu1 %v4611_v27 }
  0x40   :  { %3729 = vmatprep.subr.mxu0 %v4727_v6  ;;  %3767 = vmatpush3.msra.mxu1 %v4634_v33 }
  0x41   :  { %3730 = vmatpush3.msra.mxu0 %v4741_v16  ;;  %3768 = vmatprep.subr.mxu1 %v4640_v35 }
  0x42   :  { %3731 = vmatprep.subr.mxu0 %v4755_v50  ;;  %3769 = vmatpush3.msra.mxu1 %v4649_v39 }
  0x43   :  { %3732 = vmatpush3.msra.mxu0 %v4767_v56  ;;  %3770 = vmatprep.subr.mxu1 %v7658_v59 }
  0x44   :  { %3733 = vmatprep.subr.mxu0 %v4784_v24  ;;  %3771 = vmatpush3.msra.mxu1 %v7659_v54 }
  0x45   :  { %3734 = vmatpush3.msra.mxu0 %v4796_v46  ;;  %3772 = vmatprep.subr.mxu1 %v7661_v42 }
  0x46   :  { %3735 = vmatprep.subr.mxu0 %v4823_v47  ;;  %3773 = vmatpush3.msra.mxu1 %v7663_v31 }
  0x47   :  { %3736 = vmatpush3.msra.mxu0 %v7657_v53  ;;  %3774 = vmatprep.subr.mxu1 %v7664_v58 }
  0x48   :  { %3737 = vmatprep.subr.mxu0 %v4863_v32  ;;  %3775 = vmatpush3.msra.mxu1 %v7666_v9 }
  0x49   :  { %3738 = vmatpush3.msra.mxu0 %v7660_v23  ;;  %3776 = vmatprep.subr.mxu1 %v7667_v49 }
  0x4a   :  { %3739 = vmatprep.subr.mxu0 %v7662_v8  ;;  %3777 = vmatpush3.msra.mxu1 %v7668_v15 }
  0x4b   :  { %3740 = vmatpush3.msra.mxu0 %v4905_v45  ;;  %3778 = vmatprep.subr.mxu1 %v7669_v21 }
  0x4c   :  { %3741 = vmatprep.subr.mxu0 %v7665_v63  ;;  %660 = vmatprep.mubr.f32.mxu0 %v5060_v14 }
  0x4d   :  { %3742 = vmatpush3.msra.mxu0 %v4934_v7  ;;  %3779 = vmatpush3.msra.mxu1 %v7670_v30  ;;  %v7675_v30 = vand.u32 4294901760, %v4608_v26  ;;  %v7682_v26 = vand.u32 4294901760, %v4662_v43  ;;  %v7686_v43 = vand.u32 4294901760, %v4741_v16  ;;  %v75_v16 = vld [vmem:[%s7338_s1 + $0x1e8] sm:$0xff] }
  0x4e   :  { %3743 = vmatprep.subr.mxu0 %v4956_v13  ;;  %3780 = vmatprep.subr.mxu1 %v4852_v36  ;;  %v7673_v36 = vld [vmem:[#allocation5_spill] sm:$0xff] }
  0x4f   :  { %3744 = vmatpush3.msra.mxu0 %v4967_v1  ;;  %3781 = vmatpush3.msra.mxu1 %v4866_v61  ;;  %v7674_v61 = vand.u32 4294901760, %v7673_v36  ;;  %v7681_v36 = vand.u32 4294901760, %v5043_v22 }
  0x50   :  { %3745 = vmatprep.subr.mxu0 %v4989_v44  ;;  %3782 = vmatprep.subr.mxu1 %v4882_v60  ;;  %v7677_v60 = vld [vmem:[#allocation26_spill] sm:$0xff] }
  0x51   :  { %3746 = vmatpush3.msra.mxu0 %v4993_v17  ;;  %3783 = vmatpush3.msra.mxu1 %v4894_v51  ;;  %v7676_v51 = vand.u32 4294901760, %v4614_v28  ;;  %v7683_v28 = vand.u32 4294901760, %v4676_v48  ;;  %v60_v48 = vld [vmem:[%s7338_s1 + $0x170] sm:$0xff] }
  0x52   :  { %3747 = vmatprep.subr.mxu0 %v5003_v52  ;;  %3784 = vmatprep.subr.mxu1 %v7671_v29  ;;  %v7678_v29 = vand.u32 4294901760, %v4637_v34  ;;  %v7684_v34 = vand.u32 4294901760, %v4711_v62  ;;  %v7691_v62 = vand.u32 4294901760, %v4823_v47 }
  0x53   :  { %3748 = vmatpush3.msra.mxu0 %v5010_v55  ;;  %3785 = vmatpush3.msra.mxu1 %v7672_v0  ;;  %v7679_v0 = vand.u32 4294901760, %v5060_v14 }
  0x54   :  { %3749 = vmatprep.subr.mxu0 %v5017_v37  ;;  %3786 = vmatprep.subr.mxu1 %v4947_v57 }
  0x55   :  { %3750 = vmatpush3.msra.mxu0 %v5028_v2  ;;  %3787 = vmatpush3.msra.mxu1 %v7677_v60 }
  0x56   :  { %3751 = vmatprep.subr.mxu0 %v5053_v40  ;;  %767 = vmatprep.mubr.f32.mxu1 %v7679_v0  ;;  %v7699_v0 = vand.u32 4294901760, %v7665_v63  ;;  %v72_v63 = vld [vmem:[%s7338_s1 + $0x1d0] sm:$0xff] }
  0x57   :  { %3752 = vmatpush3.msra.mxu0 %v5057_v41  ;;  %v7680_v41 = vand.u32 4294901760, %v4646_v38  ;;  %771 = vmatmul.mubr.f32.vlgmr.msra.gmra.mxu1 %v7681_v36  ;;  %v7685_v38 = vand.u32 4294901760, %v4727_v6  ;;  %v7692_v6 = vand.u32 4294901760, %v7657_v53  ;;  %v57_v53 = vld [vmem:[%s7338_s1 + $0x158] sm:$0xff]  ;;  %v7706_v36 = vand.u32 4294901760, %v4989_v44  ;;  %v55_v44 = vld [vmem:[%s7338_s1 + $0x148] sm:$0xff] }
  0x58   :  { %663 = vmatmul.mubr.f32.vlgmr.msra.gmra.mxu0 %v5043_v22  ;;  %3791 = vmatprep.subr.mxu0 %v7674_v61  ;;  %v74_v61 = vld [vmem:[%s7338_s1 + $0x1e0] sm:$0xff]  ;;  %v7700_v22 = vand.u32 4294901760, %v4934_v7 }
  0x59   :  { %3792 = vmatpush3.msra.mxu0 %v7675_v30  ;;  %3826 = vmatprep.subr.mxu1 %v4543_v3  ;;  %v7687_v3 = vand.u32 4294901760, %v4755_v50  ;;  %v59_v50 = vld [vmem:[%s7338_s1 + $0x168] sm:$0xff]  ;;  %v5261_v14 = vand.u32 4294901760, %v74_v61 }
  0x5a   :  { %3793 = vmatprep.subr.mxu0 %v7676_v51  ;;  %3827 = vmatpush3.msra.mxu1 %v4545_v4  ;;  %v7688_v4 = vand.u32 4294901760, %v4767_v56  ;;  %v7695_v56 = vand.u32 4294901760, %v7662_v8  ;;  %v5241_v51 = vand.u32 4294901760, %v59_v50  ;;  %v7705_v8 = vand.u32 4294901760, %v4967_v1 }
  0x5b   :  { %3794 = vmatpush3.msra.mxu0 %v7678_v29  ;;  %3828 = vmatprep.subr.mxu1 %v4547_v5  ;;  %v61_v5 = vld [vmem:[%s7338_s1 + $0x178] sm:$0xff]  ;;  %7701 = vst [vmem:[#allocation7_spill] sm:$0xff] %v5261_v14 }
  0x5c   :  { %3795 = vmatprep.subr.mxu0 %v7680_v41  ;;  %3829 = vmatpush3.msra.mxu1 %v4558_v10  ;;  %v7689_v10 = vand.u32 4294901760, %v4784_v24  ;;  %v58_v24 = vld [vmem:[%s7338_s1 + $0x160] sm:$0xff]  ;;  %7698 = vst [vmem:[#allocation6_spill] sm:$0xff] %v5241_v51 }
  0x5d   :  { %3796 = vmatpush3.msra.mxu0 %v7682_v26  ;;  %3830 = vmatprep.subr.mxu1 %v4560_v11  ;;  %v77_v11 = vld [vmem:[%s7338_s1 + $0x1f8] sm:$0xff]  ;;  %v5263_v30 = vand.u32 4294901760, %v58_v24  ;;  %v5293_v26 = vand.u32 4294901760, %v57_v53 }
  0x5e   :  { %3797 = vmatprep.subr.mxu0 %v7683_v28  ;;  %3831 = vmatpush3.msra.mxu1 %v4562_v12  ;;  %v7690_v12 = vand.u32 4294901760, %v4796_v46  ;;  %v7693_v46 = vand.u32 4294901760, %v4863_v32  ;;  %v7708_v28 = vand.u32 4294901760, %v4993_v17 }
  0x5f   :  { %3798 = vmatpush3.msra.mxu0 %v7684_v34  ;;  %3832 = vmatprep.subr.mxu1 %v4578_v18  ;;  %v76_v18 = vld [vmem:[%s7338_s1 + $0x1f0] sm:$0xff]  ;;  %7702 = vst [vmem:[#allocation19_spill] sm:$0xff] %v5263_v30  ;;  %7707 = vst [vmem:[#allocation21_spill] sm:$0xff] %v5293_v26  ;;  %v5301_v34 = vsub.f32 %v58_v24, %v5263_v30 }
  0x60   :  { %3799 = vmatprep.subr.mxu0 %v7685_v38  ;;  %3833 = vmatpush3.msra.mxu1 %v4580_v19  ;;  %v5201_v19 = vand.u32 4294901760, %v61_v5  ;;  %v5214_v47 = vand.u32 4294901760, %v76_v18 }
  0x61   :  { %3800 = vmatpush3.msra.mxu0 %v7686_v43  ;;  %3834 = vmatprep.subr.mxu1 %v4583_v20  ;;  %v5206_v20 = vand.u32 4294901760, %v77_v11  ;;  %v7710_v43 = vand.u32 4294901760, %v5003_v52  ;;  %v7712_v52 = vld [vmem:[#allocation27_spill] sm:$0xff]  ;;  %v7419_v24 = vand.u32 4294901760, %v5301_v34 }
  0x62   :  { %3801 = vmatprep.subr.mxu0 %v7687_v3  ;;  %3835 = vmatpush3.msra.mxu1 %v4605_v25  ;;  %v5216_v25 = vand.u32 4294901760, %v60_v48  ;;  %v5228_v32 = vsub.f32 %v61_v5, %v5201_v19  ;;  %v71_v3 = vld [vmem:[%s7338_s1 + $0x1c8] sm:$0xff] }
  0x63   :  { %3802 = vmatpush3.msra.mxu0 %v7688_v4  ;;  %3836 = vmatprep.subr.mxu1 %v4611_v27  ;;  %v7694_v27 = vand.u32 4294901760, %v7660_v23  ;;  %v5247_v29 = vsub.f32 %v77_v11, %v5206_v20  ;;  %v56_v23 = vld [vmem:[%s7338_s1 + $0x150] sm:$0xff] }
  0x64   :  { %3803 = vmatprep.subr.mxu0 %v7689_v10  ;;  %3837 = vmatpush3.msra.mxu1 %v4634_v33  ;;  %v5230_v33 = vand.u32 4294901760, %v75_v16  ;;  %v5253_v41 = vsub.f32 %v60_v48, %v5216_v25  ;;  %v7422_v7 = vand.u32 4294901760, %v5228_v32  ;;  %v5303_v38 = vand.u32 4294901760, %v56_v23  ;;  %v7715_v48 = vld [vmem:[#allocation30_spill] sm:$0xff] }
  0x65   :  { %3804 = vmatpush3.msra.mxu0 %v7690_v12  ;;  %3838 = vmatprep.subr.mxu1 %v4640_v35  ;;  %v7697_v35 = vand.u32 4294901760, %v4905_v45  ;;  %v5256_v45 = vsub.f32 %v76_v18, %v5214_v47  ;;  %v144_v10 = vcombine.high %v7712_v52, %v7712_v52  ;;  %v7714_v18 = vand.u32 4294901760, %v5017_v37  ;;  %v70_v37 = vld [vmem:[%s7338_s1 + $0x1c0] sm:$0xff] }
  0x66   :  { %3805 = vmatprep.subr.mxu0 %v7691_v62  ;;  %3839 = vmatpush3.msra.mxu1 %v4649_v39  ;;  %7696 = vst [vmem:[#allocation16_spill] sm:$0xff] %v5230_v33  ;;  %v73_v39 = vld [vmem:[%s7338_s1 + $0x1d8] sm:$0xff]  ;;  %7709 = vst [vmem:[#allocation9_spill] sm:$0xff] %v5303_v38  ;;  %v5317_v17 = vsub.f32 %v5228_v32, %v7422_v7  ;;  %v5343_v62 = vsub.f32 %v57_v53, %v5293_v26 }
  0x67   :  { %3806 = vmatpush3.msra.mxu0 %v7692_v6  ;;  %3840 = vmatprep.subr.mxu1 %v7658_v59  ;;  %v7703_v59 = vand.u32 4294901760, %v4956_v13  ;;  %v5284_v13 = vsub.f32 %v59_v50, %v5241_v51  ;;  %v7421_v1 = vand.u32 4294901760, %v5256_v45  ;;  %v5355_v6 = vand.u32 4294901760, %v55_v44  ;;  %v7718_v50 = vld [vmem:[#allocation15_spill] sm:$0xff] }
  0x68   :  { %3807 = vmatprep.subr.mxu0 %v7693_v46  ;;  %3841 = vmatpush3.msra.mxu1 %v7659_v54  ;;  %v5271_v54 = vand.u32 4294901760, %v73_v39  ;;  %v7717_v46 = vand.u32 4294901760, %v5028_v2  ;;  %v7721_v2 = vld [vmem:[#allocation17_spill] sm:$0xff]  ;;  %v5388_v53 = vld [vmem:[%s7338_s1 + $0x1b8] sm:$0xff] }
  0x69   :  { %3808 = vmatpush3.msra.mxu0 %v7694_v27  ;;  %3842 = vmatprep.subr.mxu1 %v7661_v42  ;;  %v5278_v42 = vsub.f32 %v75_v16, %v5230_v33  ;;  %v7416_v12 = vand.u32 4294901760, %v5284_v13  ;;  %7716 = vst [vmem:[#allocation24_spill] sm:$0xff] %v5355_v6  ;;  %v54_v16 = vld [vmem:[%s7338_s1 + $0x140] sm:$0xff]  ;;  %v5367_v27 = vsub.f32 %v56_v23, %v5303_v38 }
  0x6a   :  { %3809 = vmatprep.subr.mxu0 %v7695_v56  ;;  %3843 = vmatpush3.msra.mxu1 %v7663_v31  ;;  %7704 = vst [vmem:[#allocation8_spill] sm:$0xff] %v5271_v54  ;;  %v7423_v31 = vand.u32 4294901760, %v5247_v29  ;;  %v5326_v5 = vsub.f32 %v73_v39, %v5271_v54  ;;  %v5369_v56 = vand.u32 4294901760, %v71_v3  ;;  %v7720_v39 = vand.u32 4294901760, %v5053_v40  ;;  %v7722_v40 = vld [vmem:[#allocation31_spill] sm:$0xff] }
  0x6b   :  { %3810 = vmatpush3.msra.mxu0 %v7697_v35  ;;  %3844 = vmatprep.subr.mxu1 %v7664_v58  ;;  %v7420_v58 = vand.u32 4294901760, %v5253_v41  ;;  %v7417_v4 = vand.u32 4294901760, %v5278_v42  ;;  %v53_v35 = vld [vmem:[%s7338_s1 + $0x138] sm:$0xff] }
  0x6c   :  { %3811 = vmatprep.subr.mxu0 %v7699_v0  ;;  %3845 = vmatpush3.msra.mxu1 %v7666_v9  ;;  %v5309_v9 = vsub.f32 %v74_v61, %v5261_v14  ;;  %v5336_v11 = vsub.f32 %v5247_v29, %v7423_v31  ;;  %7719 = vst [vmem:[#allocation11_spill] sm:$0xff] %v5369_v56  ;;  %v7733_v31 = vld [vmem:[#allocation23_spill] sm:$0xff] }
  0x6d   :  { %3812 = vmatpush3.msra.mxu0 %v7700_v22  ;;  %3846 = vmatprep.subr.mxu1 %v7667_v49  ;;  %v5319_v49 = vand.u32 4294901760, %v72_v63  ;;  %v5383_v22 = vsub.f32 %v5278_v42, %v7417_v4  ;;  %v68_v4 = vld [vmem:[%s7338_s1 + $0x1b0] sm:$0xff]  ;;  %v5448_v7 = vsub.f32 %v71_v3, %v5369_v56  ;;  %v7736_v3 = vld [vmem:[#allocation25_spill] sm:$0xff] }
  0x6e   :  { %3813 = vmatprep.subr.mxu0 %v7703_v59  ;;  %3847 = vmatpush3.msra.mxu1 %v7668_v15  ;;  %v7713_v15 = vand.u32 4294901760, %v5010_v55  ;;  %v5348_v55 = vsub.f32 %v5256_v45, %v7421_v1  ;;  %v7418_v61 = vand.u32 4294901760, %v5309_v9  ;;  %v7424_v59 = vand.u32 4294901760, %v5326_v5  ;;  %v52_v1 = vld [vmem:[%s7338_s1 + $0x130] sm:$0xff] }
  0x6f   :  { %3814 = vmatpush3.msra.mxu0 %v7705_v8  ;;  %7711 = vst [vmem:[#allocation10_spill] sm:$0xff] %v5319_v49  ;;  %3848 = vmatprep.subr.mxu1 %v7669_v21  ;;  %v5353_v21 = vsub.f32 %v5253_v41, %v7420_v58  ;;  %v5392_v23 = vsub.f32 %v72_v63, %v5319_v49  ;;  %v7723_v8 = vand.u32 4294901760, %v7722_v40  ;;  %v7730_v40 = vld [vmem:[#allocation20_spill] sm:$0xff]  ;;  %v5494_v58 = vand.u32 4294901760, %v52_v1 }
  0x70   :  { %3815 = vmatprep.subr.mxu0 %v7706_v36  ;;  %937 = vmatprep.mubr.f32.mxu0 %v7715_v48  ;;  %v7724_v36 = vld [vmem:[#allocation18_spill] sm:$0xff] }
  0x71   :  { %3816 = vmatpush3.msra.mxu0 %v7708_v28  ;;  %3849 = vmatpush3.msra.mxu1 %v7718_v50  ;;  %v5460_v50 = vld [vmem:[%s7338_s1 + $0x1a8] sm:$0xff]  ;;  %v7739_v28 = vld [vmem:[#allocation28_spill] sm:$0xff] }
  0x72   :  { %3817 = vmatprep.subr.mxu0 %v7710_v43  ;;  %3850 = vmatprep.subr.mxu1 %v7721_v2  ;;  %v5401_v43 = vsub.f32 %v5284_v13, %v7416_v12  ;;  %v5414_v2 = vand.u32 4294901760, %v53_v35  ;;  %v5429_v12 = vand.u32 4294901760, %v5388_v53 }
  0x73   :  { %3818 = vmatpush3.msra.mxu0 %v7713_v15  ;;  %3851 = vmatpush3.msra.mxu1 %v7724_v36  ;;  %v5403_v15 = vand.u32 4294901760, %v70_v37  ;;  %v5426_v36 = vsub.f32 %v5301_v34, %v7419_v24  ;;  %v5441_v24 = vsub.f32 %v5326_v5, %v7424_v59  ;;  %v5505_v59 = vand.u32 4294901760, %v5460_v50 }
  0x74   :  { %3819 = vmatprep.subr.mxu0 %v7714_v18  ;;  %v5405_v18 = vand.u32 4294901760, %v54_v16  ;;  %7729 = vst [vmem:[#allocation5_spill] sm:$0xff] %v5414_v2  ;;  %3852 = vmatprep.subr.mxu1 %v7730_v40  ;;  %7731 = vst [vmem:[#allocation26_spill] sm:$0xff] %v5429_v12  ;;  %v7732_v40 = vld [vmem:[#allocation22_spill] sm:$0xff] }
  0x75   :  { %3820 = vmatpush3.msra.mxu0 %v7717_v46  ;;  %7725 = vst [vmem:[#allocation12_spill] sm:$0xff] %v5403_v15  ;;  %v7727_v46 = vld [vmem:[#allocation29_spill] sm:$0xff]  ;;  %3853 = vmatpush3.msra.mxu1 %v7732_v40  ;;  %v5463_v63 = vsub.f32 %v70_v37, %v5403_v15  ;;  %v5470_v40 = vand.u32 4294901760, %v68_v4  ;;  %7741 = vst [vmem:[#allocation31_spill] sm:$0xff] %v5505_v59 }
  0x76   :  { %3821 = vmatprep.subr.mxu0 %v7720_v39  ;;  %7726 = vst [vmem:[#allocation13_spill] sm:$0xff] %v5405_v18  ;;  %v5412_v39 = vsub.f32 %v55_v44, %v5355_v6  ;;  %v7425_v44 = vand.u32 4294901760, %v5343_v62  ;;  %3854 = vmatprep.subr.mxu1 %v7733_v31  ;;  %v5468_v31 = vsub.f32 %v53_v35, %v5414_v2  ;;  %v50_v37 = vld [vmem:[%s7338_s1 + $0x120] sm:$0xff]  ;;  %v49_v35 = vld [vmem:[%s7338_s1 + $0x118] sm:$0xff] }
  0x77   :  { %3822 = vmatpush3.msra.mxu0 %v7723_v8  ;;  %v5421_v8 = vsub.f32 %v5309_v9, %v7418_v61  ;;  %v5454_v61 = vsub.f32 %v54_v16, %v5405_v18  ;;  %7735 = vst [vmem:[#allocation30_spill] sm:$0xff] %v5463_v63  ;;  %3855 = vmatpush3.msra.mxu1 %v7736_v3  ;;  %7738 = vst [vmem:[#allocation17_spill] sm:$0xff] %v5470_v40  ;;  %v51_v16 = vld [vmem:[%s7338_s1 + $0x128] sm:$0xff] }
  0x78   :  { %939 = vmatmul.mubr.f32.vlgmr.msra.gmra.mxu0 %v7727_v46  ;;  %3861 = vmatprep.subr.mxu0 %v5206_v20  ;;  %7728 = vst [vmem:[#allocation14_spill] sm:$0xff] %v5412_v39  ;;  %7737 = vst [vmem:[#allocation15_spill] sm:$0xff] %v5468_v31  ;;  %v5483_v3 = vrot.slane %v144_v10, %v7739_v28  ;;  %v5492_v0 = vsub.f32 %v5343_v62, %v7425_v44  ;;  %v7740_v10 = vand.u32 4294901760, %v5392_v23  ;;  %v66_v44 = vld [vmem:[%s7338_s1 + $0x1a0] sm:$0xff] }
  0x79   :  { %3862 = vmatpush3.msra.mxu0 %v5201_v19  ;;  %7734 = vst [vmem:[#allocation27_spill] sm:$0xff] %v5454_v61  ;;  %3856 = vmatprep.subr.mxu1 %v4947_v57  ;;  %v5536_v28 = vsub.f32 %v5388_v53, %v5429_v12  ;;  %v7747_v53 = vand.u32 4294901760, %v5317_v17  ;;  %v7750_v17 = vand.u32 4294901760, %v5348_v55  ;;  %v7752_v55 = vand.u32 4294901760, %v5353_v21 }
  0x7a   :  { %3863 = vmatprep.subr.mxu0 %v5214_v47  ;;  %3857 = vmatpush3.msra.mxu1 %v7677_v60  ;;  %v5502_v57 = vsub.f32 %v5392_v23, %v7740_v10  ;;  %v7742_v60 = vand.u32 4294901760, %v5367_v27  ;;  %v5518_v10 = vand.u32 4294901760, %v51_v16  ;;  %v7755_v21 = vand.u32 4294901760, %v5383_v22 }
  0x7b   :  { %3864 = vmatpush3.msra.mxu0 %v5216_v25  ;;  %1041 = vmatprep.mubr.f32.mxu1 %v7715_v48  ;;  %v7745_v48 = vand.u32 4294901760, %v5412_v39  ;;  %v5618_v22 = vand.u32 4294901760, %v5483_v3 }
  0x7c   :  { %3865 = vmatprep.subr.mxu0 %v5230_v33  ;;  %v5516_v52 = vsub.f32 %v5367_v27, %v7742_v60  ;;  %7743 = vst [vmem:[#allocation18_spill] sm:$0xff] %v5518_v10  ;;  %1043 = vmatmul.mubr.f32.vlgmr.msra.gmra.mxu1 %v7727_v46  ;;  %v7746_v33 = vand.u32 4294901760, %v5336_v11  ;;  %v1193_v46 = vand.u32 4294901760, %v5492_v0  ;;  %v5562_v0 = vand.u32 4294901760, %v49_v35 }
  0x7d   :  { %3866 = vmatpush3.msra.mxu0 %v5241_v51  ;;  %v160_v51 = vcombine.high %v5483_v3, %v5483_v3  ;;  %v5565_v60 = vsub.f32 %v68_v4, %v5470_v40  ;;  %v48_v4 = vld [vmem:[%s7338_s1 + $0x110] sm:$0xff]  ;;  %7758 = vst [vmem:[#allocation25_spill] sm:$0xff] %v5618_v22 }
  0x7e   :  { %3867 = vmatprep.subr.mxu0 %v5261_v14  ;;  %v5521_v14 = vand.u32 4294901760, %v50_v37  ;;  %3896 = vmatprep.subr.mxu1 %v7746_v33  ;;  %v7748_v33 = vand.u32 4294901760, %v5448_v7  ;;  %7749 = vst [vmem:[#allocation20_spill] sm:$0xff] %v5562_v0 }
  0x7f   :  { %3868 = vmatpush3.msra.mxu0 %v5263_v30  ;;  %v5531_v30 = vsub.f32 %v5412_v39, %v7745_v48  ;;  %v5547_v48 = vand.u32 4294901760, %v66_v44  ;;  %3897 = vmatpush3.msra.mxu1 %v7747_v53  ;;  %v1312_v39 = vand.u32 4294901760, %v5502_v57  ;;  %v1200_v57 = vand.u32 4294901760, %v5516_v52 }
  0x80   :  { %7744 = vst [vmem:[#allocation29_spill] sm:$0xff] %v5521_v14  ;;  %3869 = vmatprep.subr.mxu0 %v5271_v54  ;;  %v5545_v54 = vsub.f32 %v52_v1, %v5494_v58  ;;  %v5557_v11 = vsub.f32 %v5448_v7, %v7748_v33  ;;  %v65_v1 = vld [vmem:[%s7338_s1 + $0x198] sm:$0xff]  ;;  %3898 = vmatprep.subr.mxu1 %v7750_v17  ;;  %v7751_v33 = vand.u32 4294901760, %v5463_v63  ;;  %v7753_v52 = vand.u32 4294901760, %v5454_v61 }
  0x81   :  { %3870 = vmatpush3.msra.mxu0 %v5293_v26  ;;  %v5572_v53 = vsub.f32 %v51_v16, %v5518_v10  ;;  %v5580_v26 = vsub.f32 %v50_v37, %v5521_v14  ;;  %3899 = vmatpush3.msra.mxu1 %v7752_v55  ;;  %v64_v37 = vld [vmem:[%s7338_s1 + $0x190] sm:$0xff]  ;;  %v5603_v55 = vand.u32 4294901760, %v65_v1  ;;  %v7757_v16 = vand.u32 4294901760, %v5468_v31 }
  0x82   :  { %3871 = vmatprep.subr.mxu0 %v5319_v49  ;;  %v5577_v49 = vsub.f32 %v5463_v63, %v7751_v33  ;;  %v5592_v17 = vsub.f32 %v5454_v61, %v7753_v52  ;;  %3900 = vmatprep.subr.mxu1 %v7755_v21  ;;  %v63_v33 = vld [vmem:[%s7338_s1 + $0x188] sm:$0xff]  ;;  %v7759_v21 = vand.u32 4294901760, %v5401_v43  ;;  %v5628_v61 = vand.u32 4294901760, %v48_v4 }
  0x83   :  { %3872 = vmatpush3.msra.mxu0 %v5303_v38  ;;  %v5598_v38 = vand.u32 4294901760, %v160_v51  ;;  %7756 = vst [vmem:[#allocation23_spill] sm:$0xff] %v5603_v55  ;;  %v5608_v52 = vsub.f32 %v5468_v31, %v7757_v16  ;;  %v5625_v16 = vsub.f32 %v49_v35, %v5562_v0  ;;  %v5634_v43 = vand.u32 4294901760, %v64_v37  ;;  %v47_v35 = vld [vmem:[%s7338_s1 + $0x108] sm:$0xff] }
  0x84   :  { %3873 = vmatprep.subr.mxu0 %v5369_v56  ;;  %v5615_v56 = vsub.f32 %v5460_v50, %v5505_v59  ;;  %3901 = vmatpush3.msra.mxu1 %v7759_v21  ;;  %v7760_v50 = vand.u32 4294901760, %v5421_v8  ;;  %v1326_v63 = vand.u32 4294901760, %v5577_v49  ;;  %v7762_v31 = vand.u32 4294901760, %v5426_v36  ;;  %v62_v21 = vld [vmem:[%s7338_s1 + $0x180] sm:$0xff] }
  0x85   :  { %7754 = vst [vmem:[#allocation22_spill] sm:$0xff] %v5598_v38  ;;  %3874 = vmatpush3.msra.mxu0 %v5355_v6  ;;  %v1319_v6 = vand.u32 4294901760, %v5557_v11  ;;  %7761 = vst [vmem:[#allocation32_spill] sm:$0xff] %v5634_v43  ;;  %v5641_v11 = vsub.f32 %v66_v44, %v5547_v48  ;;  %v1214_v8 = vand.u32 4294901760, %v5592_v17  ;;  %v7763_v49 = vand.u32 4294901760, %v5536_v28  ;;  %1385 = vmatprep.mubr.f32.mxu1 %v5598_v38 }
  0x86   :  { %3875 = vmatprep.subr.mxu0 %v5403_v15  ;;  %3902 = vmatprep.subr.mxu1 %v7760_v50  ;;  %v5656_v44 = vsub.f32 %v160_v51, %v5598_v38  ;;  %v7764_v36 = vand.u32 4294901760, %v5441_v24  ;;  %v5671_v51 = vsub.f32 %v65_v1, %v5603_v55  ;;  %v7765_v24 = vand.u32 4294901760, %v5565_v60 }
  0x87   :  { %3876 = vmatpush3.msra.mxu0 %v5405_v18  ;;  %3903 = vmatpush3.msra.mxu1 %v7762_v31  ;;  %v1332_v50 = vsub.f32 %v5536_v28, %v7763_v49  ;;  %v5650_v18 = vand.u32 4294901760, %v63_v33  ;;  %v1221_v31 = vand.u32 4294901760, %v5608_v52  ;;  %v46_v49 = vld [vmem:[%s7338_s1 + $0x100] sm:$0xff]  ;;  %v5680_v17 = vand.u32 4294901760, %v47_v35 }
  0x88   :  { %3877 = vmatprep.subr.mxu0 %v5429_v12  ;;  %3904 = vmatprep.subr.mxu1 %v7764_v36  ;;  %v5668_v12 = vsub.f32 %v5483_v3, %v5618_v22  ;;  %v1339_v52 = vsub.f32 %v5565_v60, %v7765_v24  ;;  %v5678_v36 = vsub.f32 %v48_v4, %v5628_v61  ;;  %v7766_v3 = vand.u32 4294901760, %v5545_v54 }
  0x89   :  { %3878 = vmatpush3.msra.mxu0 %v5414_v2  ;;  %3905 = vmatpush3.msra.mxu1 %v1193_v46  ;;  %v5687_v1 = vand.u32 4294901760, %v62_v21  ;;  %v5691_v24 = vsub.f32 %v64_v37, %v5634_v43  ;;  %v1333_v4 = vand.u32 4294901760, %v1332_v50  ;;  %v5694_v15 = vand.u32 4294901760, %v46_v49 }
  0x8a   :  { %3879 = vmatprep.subr.mxu0 %v5470_v40  ;;  %3906 = vmatprep.subr.mxu1 %v1312_v39  ;;  %v1227_v46 = vsub.f32 %v5545_v54, %v7766_v3  ;;  %v7767_v3 = vand.u32 4294901760, %v5615_v56  ;;  %v7768_v50 = vand.u32 4294901760, %v5531_v30  ;;  %v1340_v2 = vand.u32 4294901760, %v1339_v52  ;;  %v7804_v38 = vld [vmem:[#allocation23_spill] sm:$0xff] }
  0x8b   :  { %3880 = vmatpush3.msra.mxu0 %v5494_v58  ;;  %3907 = vmatpush3.msra.mxu1 %v1200_v57  ;;  %v7770_v39 = vand.u32 4294901760, %v5572_v53  ;;  %v7771_v57 = vand.u32 4294901760, %v5641_v11  ;;  %v5723_v52 = vsub.f32 %v62_v21, %v5687_v1 }
  0x8c   :  { %3881 = vmatprep.subr.mxu0 %v5505_v59  ;;  %3908 = vmatprep.subr.mxu1 %v1319_v6  ;;  %v1346_v40 = vsub.f32 %v5615_v56, %v7767_v3  ;;  %v5705_v59 = vsub.f32 %v63_v33, %v5650_v18  ;;  %v5711_v6 = vsub.f32 %v47_v35, %v5680_v17  ;;  %v1228_v33 = vand.u32 4294901760, %v1227_v46 }
  0x8d   :  { %3882 = vmatpush3.msra.mxu0 %v5518_v10  ;;  %3909 = vmatpush3.msra.mxu1 %v7768_v50  ;;  %v1234_v3 = vsub.f32 %v5572_v53, %v7770_v39  ;;  %v1353_v30 = vsub.f32 %v5641_v11, %v7771_v57  ;;  %7772 = vst [vmem:[#allocation34_spill] sm:$0xff] %v5723_v52  ;;  %v7775_v46 = vand.u32 4294901760, %v5580_v26  ;;  %v7778_v57 = vand.u32 4294901760, %v5625_v16 }
  0x8e   :  { %3883 = vmatprep.subr.mxu0 %v5547_v48  ;;  %7769 = vst [vmem:[#allocation33_spill] sm:$0xff] %v5711_v6  ;;  %3910 = vmatprep.subr.mxu1 %v1326_v63  ;;  %v5727_v35 = vsub.f32 %v46_v49, %v5694_v15  ;;  %v7774_v63 = vand.u32 4294901760, %v5656_v44  ;;  %v1347_v21 = vand.u32 4294901760, %v1346_v40  ;;  %v7777_v49 = vand.u32 4294901760, %v5671_v51 }
  0x8f   :  { %3884 = vmatpush3.msra.mxu0 %v5521_v14  ;;  %3911 = vmatpush3.msra.mxu1 %v1214_v8  ;;  %v1241_v37 = vsub.f32 %v5580_v26, %v7775_v46  ;;  %v7776_v8 = vand.u32 4294901760, %v5668_v12  ;;  %v1235_v46 = vand.u32 4294901760, %v1234_v3 }
  0x90   :  { %3885 = vmatprep.subr.mxu0 %v5603_v55  ;;  %7773 = vst [vmem:[#allocation35_spill] sm:$0xff] %v5727_v35  ;;  %v1147_v39 = vsub.f32 %v5656_v44, %v7774_v63  ;;  %3912 = vmatprep.subr.mxu1 %v1333_v4  ;;  %v1360_v55 = vsub.f32 %v5671_v51, %v7777_v49 }
  0x91   :  { %3886 = vmatpush3.msra.mxu0 %v5562_v0  ;;  %v1153_v50 = vsub.f32 %v5668_v12, %v7776_v8  ;;  %3913 = vmatpush3.msra.mxu1 %v1221_v31  ;;  %v1248_v4 = vsub.f32 %v5625_v16, %v7778_v57  ;;  %v1354_v8 = vand.u32 4294901760, %v1353_v30  ;;  %v7779_v0 = vand.u32 4294901760, %v5691_v24 }
  0x92   :  { %3887 = vmatprep.subr.mxu0 %v5634_v43  ;;  %3914 = vmatprep.subr.mxu1 %v1340_v2  ;;  %v1148_v31 = vand.u32 4294901760, %v1147_v39  ;;  %v1242_v3 = vand.u32 4294901760, %v1241_v37  ;;  %v7780_v43 = vand.u32 4294901760, %v5678_v36  ;;  %v7472_v2 = vand.u32 4294901760, %v5727_v35 }
  0x93   :  { %3888 = vmatpush3.msra.mxu0 %v5628_v61  ;;  %v1367_v49 = vsub.f32 %v5691_v24, %v7779_v0  ;;  %3915 = vmatpush3.msra.mxu1 %v1228_v33  ;;  %v1154_v30 = vand.u32 4294901760, %v1153_v50  ;;  %v1361_v40 = vand.u32 4294901760, %v1360_v55  ;;  %v7781_v0 = vand.u32 4294901760, %v5705_v59 }
  0x94   :  { %3889 = vmatprep.subr.mxu0 %v5650_v18  ;;  %v1255_v57 = vsub.f32 %v5678_v36, %v7780_v43  ;;  %3916 = vmatprep.subr.mxu1 %v1347_v21  ;;  %v1249_v33 = vand.u32 4294901760, %v1248_v4  ;;  %v7782_v37 = vand.u32 4294901760, %v5711_v6  ;;  %v7783_v21 = vand.u32 4294901760, %v5723_v52 }
  0x95   :  { %3890 = vmatpush3.msra.mxu0 %v5680_v17  ;;  %v1374_v63 = vsub.f32 %v5705_v59, %v7781_v0  ;;  %3917 = vmatpush3.msra.mxu1 %v1235_v46  ;;  %v1368_v43 = vand.u32 4294901760, %v1367_v49  ;;  %v1269_v46 = vsub.f32 %v5727_v35, %v7472_v2  ;;  %v7789_v0 = vld [vmem:[#allocation27_spill] sm:$0xff]  ;;  %v7802_v2 = vld [vmem:[#allocation17_spill] sm:$0xff] }
  0x96   :  { %3891 = vmatprep.subr.mxu0 %v5687_v1  ;;  %v1262_v39 = vsub.f32 %v5711_v6, %v7782_v37  ;;  %3918 = vmatprep.subr.mxu1 %v1354_v8  ;;  %v1381_v55 = vsub.f32 %v5723_v52, %v7783_v21  ;;  %v1256_v50 = vand.u32 4294901760, %v1255_v57  ;;  %v7787_v57 = vld [vmem:[#allocation30_spill] sm:$0xff]  ;;  %v7791_v37 = vld [vmem:[#allocation8_spill] sm:$0xff] }
  0x97   :  { %3892 = vmatpush3.msra.mxu0 %v5694_v15  ;;  %1149 = vmatprep.mubr.f32.mxu0 %v1148_v31  ;;  %v1375_v4 = vand.u32 4294901760, %v1374_v63  ;;  %v1270_v31 = vand.u32 4294901760, %v1269_v46  ;;  %v7784_v63 = vld [vmem:[#allocation16_spill] sm:$0xff]  ;;  %v7794_v21 = vld [vmem:[#allocation10_spill] sm:$0xff] }
  0x98   :  { %3919 = vmatpush3.msra.mxu1 %v1242_v3  ;;  %1155 = vmatmul.mubr.f32.vlgmr.msra.gmra.mxu0 %v1154_v30  ;;  %v1263_v8 = vand.u32 4294901760, %v1262_v39  ;;  %v1382_v49 = vand.u32 4294901760, %v1381_v55  ;;  %v7786_v3 = vld [vmem:[#allocation6_spill] sm:$0xff]  ;;  %v7788_v30 = vld [vmem:[#allocation7_spill] sm:$0xff]  ;;  %v7795_v55 = vld [vmem:[#allocation9_spill] sm:$0xff] }
  0x99   :  { %3920 = vmatprep.subr.mxu1 %v1361_v40  ;;  %3931 = vmatprep.subr.mxu0 %v5247_v29  ;;  %v7785_v40 = vld [vmem:[#allocation14_spill] sm:$0xff]  ;;  %v7792_v39 = vld [vmem:[#allocation15_spill] sm:$0xff]  ;;  %v7797_v46 = vld [vmem:[#allocation24_spill] sm:$0xff] }
  0x9a   :  { %3921 = vmatpush3.msra.mxu1 %v1249_v33  ;;  %3932 = vmatpush3.msra.mxu0 %v5228_v32  ;;  %v7790_v33 = vld [vmem:[#allocation19_spill] sm:$0xff] }
  0x9b   :  { %3922 = vmatprep.subr.mxu1 %v1368_v43  ;;  %3933 = vmatprep.subr.mxu0 %v5256_v45  ;;  %v7793_v43 = vld [vmem:[#allocation21_spill] sm:$0xff] }
  0x9c   :  { %3923 = vmatpush3.msra.mxu1 %v1256_v50  ;;  %3934 = vmatpush3.msra.mxu0 %v5253_v41  ;;  %v7796_v50 = vld [vmem:[#allocation11_spill] sm:$0xff] }
  0x9d   :  { %3924 = vmatprep.subr.mxu1 %v1375_v4  ;;  %3935 = vmatprep.subr.mxu0 %v5278_v42  ;;  %v7798_v4 = vld [vmem:[#allocation12_spill] sm:$0xff] }
  0x9e   :  { %3925 = vmatpush3.msra.mxu1 %v1263_v8  ;;  %3936 = vmatpush3.msra.mxu0 %v5284_v13  ;;  %v7799_v8 = vld [vmem:[#allocation13_spill] sm:$0xff] }
  0x9f   :  { %3926 = vmatprep.subr.mxu1 %v1382_v49  ;;  %3937 = vmatprep.subr.mxu0 %v5309_v9  ;;  %v7800_v49 = vld [vmem:[#allocation26_spill] sm:$0xff] }
  0xa0   :  { %3927 = vmatpush3.msra.mxu1 %v1270_v31  ;;  %3938 = vmatpush3.msra.mxu0 %v5301_v34  ;;  %v7801_v31 = vld [vmem:[#allocation5_spill] sm:$0xff] }
  0xa1   :  { %1387 = vmatmul.mubr.f32.vlgmr.msra.gmra.mxu1 %v5618_v22  ;;  %3939 = vmatprep.subr.mxu0 %v5326_v5  ;;  %v7803_v22 = vld [vmem:[#allocation31_spill] sm:$0xff] }
  0xa2   :  { %3966 = vmatprep.subr.mxu1 %v5206_v20  ;;  %3940 = vmatpush3.msra.mxu0 %v5343_v62 }
  0xa3   :  { %3967 = vmatpush3.msra.mxu1 %v5201_v19  ;;  %3941 = vmatprep.subr.mxu0 %v5392_v23 }
  0xa4   :  { %3968 = vmatprep.subr.mxu1 %v5214_v47  ;;  %3942 = vmatpush3.msra.mxu0 %v5367_v27 }
  0xa5   :  { %3969 = vmatpush3.msra.mxu1 %v5216_v25  ;;  %3943 = vmatprep.subr.mxu0 %v5448_v7 }
  0xa6   :  { %3970 = vmatprep.subr.mxu1 %v7784_v63  ;;  %3944 = vmatpush3.msra.mxu0 %v7785_v40 }
  0xa7   :  { %3971 = vmatpush3.msra.mxu1 %v7786_v3  ;;  %3945 = vmatprep.subr.mxu0 %v7787_v57 }
  0xa8   :  { %3972 = vmatprep.subr.mxu1 %v7788_v30  ;;  %3946 = vmatpush3.msra.mxu0 %v7789_v0 }
  0xa9   :  { %3973 = vmatpush3.msra.mxu1 %v7790_v33  ;;  %3947 = vmatprep.subr.mxu0 %v5536_v28 }
  0xaa   :  { %3974 = vmatprep.subr.mxu1 %v7791_v37  ;;  %3948 = vmatpush3.msra.mxu0 %v7792_v39 }
  0xab   :  { %3975 = vmatpush3.msra.mxu1 %v7793_v43  ;;  %3949 = vmatprep.subr.mxu0 %v5565_v60 }
  0xac   :  { %3976 = vmatprep.subr.mxu1 %v7794_v21  ;;  %3950 = vmatpush3.msra.mxu0 %v5545_v54 }
  0xad   :  { %3977 = vmatpush3.msra.mxu1 %v7795_v55  ;;  %3951 = vmatprep.subr.mxu0 %v5615_v56 }
  0xae   :  { %3978 = vmatprep.subr.mxu1 %v7796_v50  ;;  %3952 = vmatpush3.msra.mxu0 %v5572_v53 }
  0xaf   :  { %3979 = vmatpush3.msra.mxu1 %v7797_v46  ;;  %3953 = vmatprep.subr.mxu0 %v5641_v11 }
  0xb0   :  { %3980 = vmatprep.subr.mxu1 %v7798_v4  ;;  %3954 = vmatpush3.msra.mxu0 %v5580_v26 }
  0xb1   :  { %3981 = vmatpush3.msra.mxu1 %v7799_v8  ;;  %3955 = vmatprep.subr.mxu0 %v5671_v51 }
  0xb2   :  { %3982 = vmatprep.subr.mxu1 %v7800_v49  ;;  %3956 = vmatpush3.msra.mxu0 %v5625_v16 }
  0xb3   :  { %3983 = vmatpush3.msra.mxu1 %v7801_v31  ;;  %3957 = vmatprep.subr.mxu0 %v5691_v24 }
  0xb4   :  { %3984 = vmatprep.subr.mxu1 %v7802_v2  ;;  %3958 = vmatpush3.msra.mxu0 %v5678_v36 }
  0xb5   :  { %3985 = vmatpush3.msra.mxu1 %v5494_v58  ;;  %3959 = vmatprep.subr.mxu0 %v5705_v59 }
  0xb6   :  { %3986 = vmatprep.subr.mxu1 %v7803_v22  ;;  %3960 = vmatpush3.msra.mxu0 %v5711_v6  ;;  %v7805_v22 = vand.u32 4294901760, %v5247_v29  ;;  %v7806_v6 = vld [vmem:[#allocation20_spill] sm:$0xff]  ;;  %v7811_v29 = vand.u32 4294901760, %v5278_v42  ;;  %v7816_v42 = vand.u32 4294901760, %v5668_v12 }
  0xb7   :  { %3987 = vmatpush3.msra.mxu1 %v5518_v10  ;;  %3961 = vmatprep.subr.mxu0 %v5723_v52  ;;  %v7807_v10 = vand.u32 4294901760, %v5228_v32  ;;  %v7808_v52 = vld [vmem:[#allocation32_spill] sm:$0xff]  ;;  %v7812_v32 = vand.u32 4294901760, %v5284_v13  ;;  %v7818_v13 = vand.u32 4294901760, %v5343_v62  ;;  %v108_v62 = vld [vmem:[%s7338_s1 + $0x2f0] sm:$0xff] }
  0xb8   :  { %3988 = vmatprep.subr.mxu1 %v5547_v48  ;;  %3962 = vmatpush3.msra.mxu0 %v5727_v35  ;;  %v7809_v35 = vand.u32 4294901760, %v5256_v45  ;;  %v7813_v45 = vand.u32 4294901760, %v5309_v9  ;;  %v7819_v9 = vand.u32 4294901760, %v5392_v23  ;;  %v7826_v23 = vand.u32 4294901760, %v7792_v39 }
  0xb9   :  { %1522 = vmatprep.mubr.f32.mxu0 %v5656_v44  ;;  %3989 = vmatpush3.msra.mxu1 %v5521_v14  ;;  %v7810_v14 = vand.u32 4294901760, %v5253_v41  ;;  %v7814_v41 = vand.u32 4294901760, %v5656_v44  ;;  %v107_v44 = vld [vmem:[%s7338_s1 + $0x2e8] sm:$0xff]  ;;  %v7833_v39 = vand.u32 4294901760, %v5641_v11  ;;  %v105_v11 = vld [vmem:[%s7338_s1 + $0x2d8] sm:$0xff] }
  0xba   :  { %1525 = vmatmul.mubr.f32.vlgmr.msra.gmra.mxu0 %v5668_v12  ;;  %3990 = vmatprep.subr.mxu1 %v7804_v38  ;;  %v93_v12 = vld [vmem:[%s7338_s1 + $0x278] sm:$0xff] }
  0xbb   :  { %4001 = vmatprep.subr.mxu0 %v7805_v22  ;;  %3991 = vmatpush3.msra.mxu1 %v7806_v6  ;;  %v92_v22 = vld [vmem:[%s7338_s1 + $0x270] sm:$0xff] }
  0xbc   :  { %4002 = vmatpush3.msra.mxu0 %v7807_v10  ;;  %3992 = vmatprep.subr.mxu1 %v7808_v52  ;;  %v7817_v10 = vand.u32 4294901760, %v5326_v5  ;;  %v7821_v5 = vand.u32 4294901760, %v5448_v7 }
  0xbd   :  { %4003 = vmatprep.subr.mxu0 %v7809_v35  ;;  %3993 = vmatpush3.msra.mxu1 %v5628_v61  ;;  %v7827_v35 = vand.u32 4294901760, %v5565_v60  ;;  %v7829_v60 = vand.u32 4294901760, %v5615_v56  ;;  %v90_v56 = vld [vmem:[%s7338_s1 + $0x260] sm:$0xff] }
  0xbe   :  { %4004 = vmatpush3.msra.mxu0 %v7810_v14  ;;  %3994 = vmatprep.subr.mxu1 %v5650_v18  ;;  %v7815_v14 = vand.u32 4294901760, %v5301_v34  ;;  %v7820_v34 = vand.u32 4294901760, %v5367_v27  ;;  %v7825_v27 = vand.u32 4294901760, %v5536_v28  ;;  %v5911_v28 = vand.u32 4294901760, %v93_v12 }
  0xbf   :  { %4005 = vmatprep.subr.mxu0 %v7811_v29  ;;  %3995 = vmatpush3.msra.mxu1 %v5680_v17  ;;  %v7836_v29 = vand.u32 4294901760, %v5671_v51  ;;  %v7838_v51 = vand.u32 4294901760, %v5625_v16  ;;  %v103_v16 = vld [vmem:[%s7338_s1 + $0x2c8] sm:$0xff] }
  0xc0   :  { %4006 = vmatpush3.msra.mxu0 %v7812_v32  ;;  %3996 = vmatprep.subr.mxu1 %v5687_v1 }
  0xc1   :  { %4007 = vmatprep.subr.mxu0 %v7813_v45  ;;  %3997 = vmatpush3.msra.mxu1 %v5694_v15  ;;  %v88_v45 = vld [vmem:[%s7338_s1 + $0x250] sm:$0xff] }
  0xc2   :  { %1629 = vmatprep.mubr.f32.mxu1 %v7814_v41  ;;  %4008 = vmatpush3.msra.mxu0 %v7815_v14 }
  0xc3   :  { %1633 = vmatmul.mubr.f32.vlgmr.msra.gmra.mxu1 %v7816_v42  ;;  %4009 = vmatprep.subr.mxu0 %v7817_v10  ;;  %v7840_v42 = vand.u32 4294901760, %v5691_v24  ;;  %v5991_v10 = vand.u32 4294901760, %v105_v11 }
  0xc4   :  { %4036 = vmatprep.subr.mxu1 %v5206_v20  ;;  %4010 = vmatpush3.msra.mxu0 %v7818_v13  ;;  %v109_v20 = vld [vmem:[%s7338_s1 + $0x2f8] sm:$0xff] }
  0xc5   :  { %4037 = vmatpush3.msra.mxu1 %v5201_v19  ;;  %4011 = vmatprep.subr.mxu0 %v7819_v9  ;;  %v7822_v19 = vand.u32 4294901760, %v7785_v40  ;;  %v5888_v7 = vand.u32 4294901760, %v109_v20  ;;  %v91_v40 = vld [vmem:[%s7338_s1 + $0x268] sm:$0xff]  ;;  %7841 = vst [vmem:[#allocation27_spill] sm:$0xff] %v5991_v10 }
  0xc6   :  { %4038 = vmatprep.subr.mxu1 %v5214_v47  ;;  %4012 = vmatpush3.msra.mxu0 %v7820_v34  ;;  %v7823_v47 = vand.u32 4294901760, %v7787_v57  ;;  %v6008_v34 = vand.u32 4294901760, %v88_v45 }
  0xc7   :  { %4039 = vmatpush3.msra.mxu1 %v5216_v25  ;;  %4013 = vmatprep.subr.mxu0 %v7821_v5  ;;  %v7824_v25 = vand.u32 4294901760, %v7789_v0  ;;  %v5922_v57 = vsub.f32 %v109_v20, %v5888_v7  ;;  %v5929_v0 = vand.u32 4294901760, %v107_v44  ;;  %v87_v5 = vld [vmem:[%s7338_s1 + $0x248] sm:$0xff] }
  0xc8   :  { %4040 = vmatprep.subr.mxu1 %v7784_v63  ;;  %4014 = vmatpush3.msra.mxu0 %v7822_v19  ;;  %v5913_v63 = vand.u32 4294901760, %v108_v62  ;;  %7844 = vst [vmem:[#allocation8_spill] sm:$0xff] %v6008_v34 }
  0xc9   :  { %4041 = vmatpush3.msra.mxu1 %v7786_v3  ;;  %4015 = vmatprep.subr.mxu0 %v7823_v47  ;;  %v7828_v3 = vand.u32 4294901760, %v5545_v54  ;;  %7830 = vst [vmem:[#allocation16_spill] sm:$0xff] %v5929_v0  ;;  %v7831_v54 = vand.u32 4294901760, %v5572_v53  ;;  %v5978_v41 = vsub.f32 %v107_v44, %v5929_v0  ;;  %v7851_v44 = vld [vmem:[#allocation34_spill] sm:$0xff] }
  0xca   :  { %4042 = vmatprep.subr.mxu1 %v7788_v30  ;;  %4016 = vmatpush3.msra.mxu0 %v7824_v25  ;;  %v5927_v30 = vand.u32 4294901760, %v92_v22  ;;  %v5952_v53 = vsub.f32 %v108_v62, %v5913_v63  ;;  %v7846_v25 = vld [vmem:[#allocation31_spill] sm:$0xff] }
  0xcb   :  { %4043 = vmatpush3.msra.mxu1 %v7790_v33  ;;  %4017 = vmatprep.subr.mxu0 %v7825_v27  ;;  %v106_v33 = vld [vmem:[%s7338_s1 + $0x2e0] sm:$0xff]  ;;  %v7483_v47 = vand.u32 4294901760, %v5978_v41 }
  0xcc   :  { %4044 = vmatprep.subr.mxu1 %v7791_v37  ;;  %4018 = vmatpush3.msra.mxu0 %v7826_v23  ;;  %v5937_v37 = vand.u32 4294901760, %v91_v40  ;;  %v5967_v32 = vsub.f32 %v92_v22, %v5927_v30  ;;  %v7486_v9 = vand.u32 4294901760, %v5952_v53  ;;  %v6030_v23 = vand.u32 4294901760, %v103_v16  ;;  %v7850_v22 = vld [vmem:[#allocation18_spill] sm:$0xff] }
  0xcd   :  { %4045 = vmatpush3.msra.mxu1 %v7793_v43  ;;  %4019 = vmatprep.subr.mxu0 %v7827_v35  ;;  %v5946_v43 = vsub.f32 %v93_v12, %v5911_v28  ;;  %v7847_v12 = vld [vmem:[#allocation33_spill] sm:$0xff]  ;;  %v7852_v35 = vand.u32 4294901760, %v7851_v44 }
  0xce   :  { %4046 = vmatprep.subr.mxu1 %v7794_v21  ;;  %4020 = vmatpush3.msra.mxu0 %v7828_v3  ;;  %7832 = vst [vmem:[#allocation14_spill] sm:$0xff] %v5937_v37  ;;  %v89_v21 = vld [vmem:[%s7338_s1 + $0x258] sm:$0xff]  ;;  %v7485_v19 = vand.u32 4294901760, %v5967_v32  ;;  %v7848_v62 = vand.u32 4294901760, %v7847_v12  ;;  %7849 = vst [vmem:[#allocation15_spill] sm:$0xff] %v6030_v23  ;;  %v6047_v3 = vsub.f32 %v5952_v53, %v7486_v9 }
  0xcf   :  { %4047 = vmatpush3.msra.mxu1 %v7795_v55  ;;  %4021 = vmatprep.subr.mxu0 %v7829_v60  ;;  %v7834_v55 = vand.u32 4294901760, %v5580_v26  ;;  %v104_v26 = vld [vmem:[%s7338_s1 + $0x2d0] sm:$0xff]  ;;  %v5986_v14 = vand.u32 4294901760, %v89_v21  ;;  %v7487_v13 = vand.u32 4294901760, %v5946_v43  ;;  %v6049_v60 = vand.u32 4294901760, %v87_v5 }
  0xd0   :  { %4048 = vmatprep.subr.mxu1 %v7796_v50  ;;  %4022 = vmatpush3.msra.mxu0 %v7831_v54  ;;  %v5957_v50 = vand.u32 4294901760, %v106_v33  ;;  %v6055_v54 = vsub.f32 %v105_v11, %v5991_v10  ;;  %v6078_v11 = vsub.f32 %v5978_v41, %v7483_v47  ;;  %v6097_v44 = vsub.f32 %v103_v16, %v6030_v23  ;;  %v6124_v47 = vld [vmem:[%s7337_s0 + $0x8] sm:$0xff] }
  0xd1   :  { %4049 = vmatpush3.msra.mxu1 %v7797_v46  ;;  %4023 = vmatprep.subr.mxu0 %v7833_v39  ;;  %v7489_v46 = vand.u32 4294901760, %v5922_v57  ;;  %7839 = vst [vmem:[#allocation7_spill] sm:$0xff] %v5986_v14  ;;  %v6028_v27 = vsub.f32 %v89_v21, %v5986_v14  ;;  %7853 = vst [vmem:[#allocation21_spill] sm:$0xff] %v6049_v60 }
  0xd2   :  { %4050 = vmatprep.subr.mxu1 %v7798_v4  ;;  %4024 = vmatpush3.msra.mxu0 %v7834_v55  ;;  %7835 = vst [vmem:[#allocation6_spill] sm:$0xff] %v5957_v50  ;;  %v5969_v4 = vand.u32 4294901760, %v90_v56  ;;  %v6014_v20 = vsub.f32 %v106_v33, %v5957_v50  ;;  %v102_v33 = vld [vmem:[%s7338_s1 + $0x2c0] sm:$0xff]  ;;  %v6062_v55 = vsub.f32 %v88_v45, %v6008_v34  ;;  %7863 = vst [vmem:[#allocation12_spill] sm:$0xff] %v6124_v47 }
  0xd3   :  { %4051 = vmatpush3.msra.mxu1 %v7799_v8  ;;  %4025 = vmatprep.subr.mxu0 %v7836_v29  ;;  %v5984_v8 = vsub.f32 %v91_v40, %v5937_v37  ;;  %v6004_v24 = vsub.f32 %v5922_v57, %v7489_v46  ;;  %v6042_v40 = vsub.f32 %v5946_v43, %v7487_v13  ;;  %v7495_v46 = vand.u32 4294901760, %v6097_v44  ;;  %v83_v13 = vld [vmem:[%s7338_s1 + $0x228] sm:$0xff] }
  0xd4   :  { %7837 = vst [vmem:[#allocation30_spill] sm:$0xff] %v5969_v4  ;;  %4052 = vmatprep.subr.mxu1 %v7800_v49  ;;  %4026 = vmatpush3.msra.mxu0 %v7838_v51  ;;  %v7842_v49 = vand.u32 4294901760, %v5678_v36  ;;  %v7845_v36 = vand.u32 4294901760, %v5705_v59  ;;  %v86_v59 = vld [vmem:[%s7338_s1 + $0x240] sm:$0xff]  ;;  %v7484_v29 = vand.u32 4294901760, %v6014_v20 }
  0xd5   :  { %4053 = vmatpush3.msra.mxu1 %v7801_v31  ;;  %4027 = vmatprep.subr.mxu0 %v7840_v42  ;;  %v6006_v31 = vand.u32 4294901760, %v104_v26  ;;  %v7856_v42 = vld [vmem:[#allocation22_spill] sm:$0xff]  ;;  %v6080_v45 = vand.u32 4294901760, %v86_v59 }
  0xd6   :  { %4054 = vmatprep.subr.mxu1 %v7802_v2  ;;  %4028 = vmatpush3.msra.mxu0 %v7842_v49  ;;  %v6020_v2 = vsub.f32 %v90_v56, %v5969_v4  ;;  %v7854_v56 = vld [vmem:[#allocation35_spill] sm:$0xff]  ;;  %v7857_v49 = vld [vmem:[#allocation29_spill] sm:$0xff]  ;;  %v6112_v16 = vsub.f32 %v6014_v20, %v7484_v29 }
  0xd7   :  { %7843 = vst [vmem:[#allocation19_spill] sm:$0xff] %v6006_v31  ;;  %4055 = vmatpush3.msra.mxu1 %v5494_v58  ;;  %4029 = vmatprep.subr.mxu0 %v7845_v36  ;;  %v7482_v58 = vand.u32 4294901760, %v5984_v8  ;;  %v7855_v39 = vand.u32 4294901760, %v7854_v56  ;;  %v6066_v51 = vsub.f32 %v104_v26, %v6006_v31  ;;  %7858 = vst [vmem:[#allocation10_spill] sm:$0xff] %v6080_v45  ;;  %v101_v26 = vld [vmem:[%s7338_s1 + $0x2b8] sm:$0xff] }
  0xd8   :  { %4056 = vmatprep.subr.mxu1 %v7846_v25  ;;  %4030 = vmatpush3.msra.mxu0 %v7848_v62  ;;  %v7488_v36 = vand.u32 4294901760, %v6020_v2  ;;  %v7859_v25 = vld [vmem:[#allocation25_spill] sm:$0xff]  ;;  %v6093_v62 = vand.u32 4294901760, %v102_v33  ;;  %v6104_v56 = vsub.f32 %v87_v5, %v6049_v60 }
  0xd9   :  { %4057 = vmatpush3.msra.mxu1 %v7850_v22  ;;  %4031 = vmatprep.subr.mxu0 %v7852_v35  ;;  %v6091_v12 = vsub.f32 %v5984_v8, %v7482_v58  ;;  %v7490_v22 = vand.u32 4294901760, %v6028_v27  ;;  %v7492_v5 = vand.u32 4294901760, %v6066_v51  ;;  %v7493_v58 = vand.u32 4294901760, %v6062_v55 }
  0xda   :  { %4058 = vmatprep.subr.mxu1 %v5547_v48  ;;  %4032 = vmatpush3.msra.mxu0 %v7855_v39  ;;  %v6073_v48 = vsub.f32 %v5967_v32, %v7485_v19  ;;  %7860 = vst [vmem:[#allocation9_spill] sm:$0xff] %v6093_v62  ;;  %7861 = vst [vmem:[#allocation11_spill] sm:$0xff] %v6104_v56  ;;  %v7491_v39 = vand.u32 4294901760, %v6055_v54  ;;  %v6131_v19 = vsub.f32 %v86_v59, %v6080_v45  ;;  %v100_v59 = vld [vmem:[%s7338_s1 + $0x2b0] sm:$0xff] }
  0xdb   :  { %1799 = vmatprep.mubr.f32.mxu0 %v7856_v42  ;;  %4059 = vmatpush3.msra.mxu1 %v7857_v49  ;;  %v6114_v49 = vand.u32 4294901760, %v101_v26  ;;  %v6136_v9 = vsub.f32 %v6020_v2, %v7488_v36  ;;  %v84_v36 = vld [vmem:[%s7338_s1 + $0x230] sm:$0xff]  ;;  %v6154_v29 = vsub.f32 %v102_v33, %v6093_v62  ;;  %v6184_v35 = vsub.f32 %v6062_v55, %v7493_v58 }
  0xdc   :  { %1801 = vmatmul.mubr.f32.vlgmr.msra.gmra.mxu0 %v7859_v25  ;;  %4060 = vmatprep.subr.mxu1 %v7804_v38  ;;  %7864 = vst [vmem:[#allocation13_spill] sm:$0xff] %v6131_v19  ;;  %v7867_v38 = vld [vmem:[#allocation28_spill] sm:$0xff] }
  0xdd   :  { %4071 = vmatprep.subr.mxu0 %v5888_v7  ;;  %4061 = vmatpush3.msra.mxu1 %v7806_v6  ;;  %7862 = vst [vmem:[#allocation24_spill] sm:$0xff] %v6114_v49  ;;  %v85_v6 = vld [vmem:[%s7338_s1 + $0x238] sm:$0xff]  ;;  %7865 = vst [vmem:[#allocation26_spill] sm:$0xff] %v6154_v29  ;;  %v6171_v33 = vrot.slane %v6124_v47, %v7867_v38  ;;  %v6187_v21 = vsub.f32 %v101_v26, %v6114_v49  ;;  %v82_v47 = vld [vmem:[%s7338_s1 + $0x220] sm:$0xff] }
  0xde   :  { %4072 = vmatpush3.msra.mxu0 %v5911_v28  ;;  %4062 = vmatprep.subr.mxu1 %v7808_v52  ;;  %v6194_v52 = vand.u32 4294901760, %v84_v36  ;;  %v98_v38 = vld [vmem:[%s7338_s1 + $0x2a0] sm:$0xff] }
  0xdf   :  { %4073 = vmatprep.subr.mxu0 %v5913_v63  ;;  %4063 = vmatpush3.msra.mxu1 %v5628_v61  ;;  %v6144_v61 = vsub.f32 %v6028_v27, %v7490_v22  ;;  %v6163_v22 = vand.u32 4294901760, %v85_v6  ;;  %7868 = vst [vmem:[#allocation17_spill] sm:$0xff] %v6187_v21 }
  0xe0   :  { %4074 = vmatpush3.msra.mxu0 %v5927_v30  ;;  %4064 = vmatprep.subr.mxu1 %v5650_v18  ;;  %v6161_v18 = vsub.f32 %v6055_v54, %v7491_v39  ;;  %v6179_v39 = vsub.f32 %v6066_v51, %v7492_v5  ;;  %7870 = vst [vmem:[#allocation20_spill] sm:$0xff] %v6194_v52  ;;  %v99_v5 = vld [vmem:[%s7338_s1 + $0x2a8] sm:$0xff] }
  0xe1   :  { %4075 = vmatprep.subr.mxu0 %v5929_v0  ;;  %4065 = vmatpush3.msra.mxu1 %v5680_v17  ;;  %7866 = vst [vmem:[#allocation5_spill] sm:$0xff] %v6163_v22  ;;  %v6192_v17 = vand.u32 4294901760, %v100_v59  ;;  %v6218_v26 = vsub.f32 %v85_v6, %v6163_v22 }
  0xe2   :  { %4076 = vmatpush3.msra.mxu0 %v5937_v37  ;;  %4066 = vmatprep.subr.mxu1 %v5687_v1  ;;  %v6208_v1 = vand.u32 4294901760, %v83_v13  ;;  %v7875_v37 = vand.u32 4294901760, %v6042_v40  ;;  %v95_v40 = vld [vmem:[%s7338_s1 + $0x288] sm:$0xff] }
  0xe3   :  { %4077 = vmatprep.subr.mxu0 %v5957_v50  ;;  %4067 = vmatpush3.msra.mxu1 %v5694_v15  ;;  %7869 = vst [vmem:[#allocation23_spill] sm:$0xff] %v6192_v17  ;;  %v6206_v15 = vsub.f32 %v6097_v44, %v7495_v46  ;;  %v7872_v46 = vand.u32 4294901760, %v6104_v56  ;;  %v81_v50 = vld [vmem:[%s7338_s1 + $0x218] sm:$0xff] }
  0xe4   :  { %1903 = vmatprep.mubr.f32.mxu1 %v7856_v42  ;;  %4078 = vmatpush3.msra.mxu0 %v5969_v4  ;;  %7871 = vst [vmem:[#allocation32_spill] sm:$0xff] %v6208_v1  ;;  %v2167_v42 = vand.u32 4294901760, %v6161_v18  ;;  %v176_v4 = vcombine.high %v6171_v33, %v6171_v33  ;;  %v7877_v18 = vand.u32 4294901760, %v6131_v19 }
  0xe5   :  { %1905 = vmatmul.mubr.f32.vlgmr.msra.gmra.mxu1 %v7859_v25  ;;  %4079 = vmatprep.subr.mxu0 %v5991_v10  ;;  %v6223_v58 = vsub.f32 %v6104_v56, %v7872_v46  ;;  %v7873_v25 = vand.u32 4294901760, %v6004_v24  ;;  %v6235_v10 = vand.u32 4294901760, %v99_v5  ;;  %v6245_v24 = vsub.f32 %v84_v36, %v6194_v52  ;;  %v97_v46 = vld [vmem:[%s7338_s1 + $0x298] sm:$0xff] }
  0xe6   :  { %4080 = vmatpush3.msra.mxu0 %v5986_v14  ;;  %v6252_v6 = vsub.f32 %v6131_v19, %v7877_v18  ;;  %v6258_v14 = vsub.f32 %v100_v59, %v6192_v17  ;;  %v6265_v36 = vsub.f32 %v83_v13, %v6208_v1  ;;  %v7879_v18 = vand.u32 4294901760, %v6154_v29  ;;  %v80_v59 = vld [vmem:[%s7338_s1 + $0x210] sm:$0xff] }
  0xe7   :  { %4106 = vmatprep.subr.mxu1 %v7873_v25  ;;  %7874 = vst [vmem:[#allocation31_spill] sm:$0xff] %v6235_v10  ;;  %4081 = vmatprep.subr.mxu0 %v6006_v31  ;;  %v6247_v25 = vand.u32 4294901760, %v82_v47  ;;  %v6267_v31 = vand.u32 4294901760, %v98_v38  ;;  %v6281_v13 = vand.u32 4294901760, %v81_v50  ;;  %v6306_v56 = vand.u32 4294901760, %v6171_v33 }
  0xe8   :  { %4107 = vmatpush3.msra.mxu1 %v7875_v37  ;;  %v7878_v37 = vand.u32 4294901760, %v6047_v3  ;;  %4082 = vmatpush3.msra.mxu0 %v6008_v34  ;;  %v6272_v19 = vsub.f32 %v6154_v29, %v7879_v18  ;;  %v7880_v3 = vand.u32 4294901760, %v6073_v48  ;;  %v96_v18 = vld [vmem:[%s7338_s1 + $0x290] sm:$0xff]  ;;  %v6287_v34 = vand.u32 4294901760, %v176_v4 }
  0xe9   :  { %7876 = vst [vmem:[#allocation33_spill] sm:$0xff] %v6247_v25  ;;  %4083 = vmatprep.subr.mxu0 %v6030_v23  ;;  %7881 = vst [vmem:[#allocation18_spill] sm:$0xff] %v6281_v13  ;;  %v7883_v29 = vand.u32 4294901760, %v6078_v11  ;;  %v6292_v48 = vand.u32 4294901760, %v97_v46  ;;  %v6303_v23 = vsub.f32 %v99_v5, %v6235_v10  ;;  %v6312_v11 = vsub.f32 %v82_v47, %v6247_v25  ;;  %v79_v47 = vld [vmem:[%s7338_s1 + $0x208] sm:$0xff] }
  0xea   :  { %4108 = vmatprep.subr.mxu1 %v7878_v37  ;;  %7882 = vst [vmem:[#allocation34_spill] sm:$0xff] %v6287_v34  ;;  %4084 = vmatpush3.msra.mxu0 %v6049_v60  ;;  %7886 = vst [vmem:[#allocation22_spill] sm:$0xff] %v6306_v56  ;;  %v7888_v5 = vand.u32 4294901760, %v6112_v16  ;;  %v2188_v0 = vand.u32 4294901760, %v6272_v19  ;;  %v7890_v60 = vand.u32 4294901760, %v6136_v9  ;;  %v6335_v16 = vsub.f32 %v81_v50, %v6281_v13 }
  0xeb   :  { %4109 = vmatpush3.msra.mxu1 %v7880_v3  ;;  %7884 = vst [vmem:[#allocation35_spill] sm:$0xff] %v6292_v48  ;;  %v7885_v3 = vand.u32 4294901760, %v6187_v21  ;;  %4085 = vmatprep.subr.mxu0 %v6093_v62  ;;  %v7891_v19 = vand.u32 4294901760, %v6218_v26  ;;  %v7894_v62 = vand.u32 4294901760, %v6179_v39 }
  0xec   :  { %4110 = vmatprep.subr.mxu1 %v7883_v29  ;;  %v7887_v29 = vand.u32 4294901760, %v6091_v12  ;;  %4086 = vmatpush3.msra.mxu0 %v6080_v45  ;;  %v6322_v12 = vand.u32 4294901760, %v96_v18  ;;  %v94_v45 = vld [vmem:[%s7338_s1 + $0x280] sm:$0xff] }
  0xed   :  { %v6297_v37 = vsub.f32 %v6187_v21, %v7885_v3  ;;  %v2076_v3 = vand.u32 4294901760, %v6252_v6  ;;  %v6316_v21 = vand.u32 4294901760, %v80_v59  ;;  %v6329_v6 = vsub.f32 %v98_v38, %v6267_v31  ;;  %4087 = vmatprep.subr.mxu0 %v6114_v49  ;;  %2247 = vmatprep.mubr.f32.mxu1 %v6287_v34 }
  0xee   :  { %4111 = vmatpush3.msra.mxu1 %v7887_v29  ;;  %7889 = vst [vmem:[#allocation29_spill] sm:$0xff] %v6322_v12  ;;  %v6340_v29 = vand.u32 4294901760, %v95_v40  ;;  %v6346_v38 = vsub.f32 %v176_v4, %v6287_v34  ;;  %4088 = vmatpush3.msra.mxu0 %v6163_v22  ;;  %v6359_v49 = vsub.f32 %v97_v46, %v6292_v48  ;;  %v7892_v4 = vand.u32 4294901760, %v6144_v61 }
  0xef   :  { %4112 = vmatprep.subr.mxu1 %v7888_v5  ;;  %v2082_v5 = vsub.f32 %v6218_v26, %v7891_v19  ;;  %v2195_v9 = vand.u32 4294901760, %v6297_v37  ;;  %v6356_v19 = vsub.f32 %v6171_v33, %v6306_v56  ;;  %4089 = vmatprep.subr.mxu0 %v6192_v17  ;;  %v6368_v50 = vsub.f32 %v80_v59, %v6316_v21 }
  0xf0   :  { %4113 = vmatpush3.msra.mxu1 %v7890_v60  ;;  %v78_v60 = vld [vmem:[%s7338_s1 + $0x200] sm:$0xff]  ;;  %v6370_v22 = vand.u32 4294901760, %v79_v47  ;;  %4090 = vmatpush3.msra.mxu0 %v6194_v52  ;;  %v7895_v61 = vand.u32 4294901760, %v6245_v24  ;;  %v6383_v59 = vsub.f32 %v96_v18, %v6322_v12  ;;  %v7896_v17 = vand.u32 4294901760, %v6184_v35 }
  0xf1   :  { %4114 = vmatprep.subr.mxu1 %v2167_v42  ;;  %v7893_v42 = vand.u32 4294901760, %v6258_v14  ;;  %4091 = vmatprep.subr.mxu0 %v6235_v10  ;;  %v2083_v39 = vand.u32 4294901760, %v2082_v5  ;;  %v7898_v18 = vand.u32 4294901760, %v6303_v23  ;;  %v6401_v5 = vsub.f32 %v95_v40, %v6340_v29 }
  0xf2   :  { %4115 = vmatpush3.msra.mxu1 %v7892_v4  ;;  %v2089_v46 = vsub.f32 %v6245_v24, %v7895_v61  ;;  %v6379_v4 = vand.u32 4294901760, %v94_v45  ;;  %v7897_v61 = vand.u32 4294901760, %v6206_v15  ;;  %4092 = vmatpush3.msra.mxu0 %v6208_v1  ;;  %v7899_v33 = vand.u32 4294901760, %v6223_v58  ;;  %v7935_v34 = vld [vmem:[#allocation35_spill] sm:$0xff] }
  0xf3   :  { %v2201_v37 = vsub.f32 %v6258_v14, %v7893_v42  ;;  %4116 = vmatprep.subr.mxu1 %v7894_v62  ;;  %v6388_v62 = vand.u32 4294901760, %v78_v60  ;;  %v2208_v42 = vsub.f32 %v6303_v23, %v7898_v18  ;;  %4093 = vmatprep.subr.mxu0 %v6267_v31  ;;  %v7901_v52 = vand.u32 4294901760, %v6265_v36 }
  0xf4   :  { %4117 = vmatpush3.msra.mxu1 %v7896_v17  ;;  %4094 = vmatpush3.msra.mxu0 %v6247_v25  ;;  %v2090_v40 = vand.u32 4294901760, %v2089_v46  ;;  %v7902_v17 = vand.u32 4294901760, %v6329_v6  ;;  %v7906_v46 = vand.u32 4294901760, %v6312_v11 }
  0xf5   :  { %4118 = vmatprep.subr.mxu1 %v7897_v61  ;;  %v2202_v15 = vand.u32 4294901760, %v2201_v37  ;;  %v6407_v61 = vsub.f32 %v79_v47, %v6370_v22  ;;  %v2096_v18 = vsub.f32 %v6265_v36, %v7901_v52  ;;  %v6419_v37 = vsub.f32 %v94_v45, %v6379_v4  ;;  %4095 = vmatprep.subr.mxu0 %v6292_v48 }
  0xf6   :  { %4119 = vmatpush3.msra.mxu1 %v7899_v33  ;;  %v2215_v58 = vsub.f32 %v6329_v6, %v7902_v17  ;;  %v6423_v52 = vsub.f32 %v78_v60, %v6388_v62  ;;  %v2103_v35 = vsub.f32 %v6312_v11, %v7906_v46  ;;  %4096 = vmatpush3.msra.mxu0 %v6281_v13  ;;  %v2209_v45 = vand.u32 4294901760, %v2208_v42 }
  0xf7   :  { %7900 = vst [vmem:[#allocation25_spill] sm:$0xff] %v6407_v61  ;;  %4120 = vmatprep.subr.mxu1 %v2188_v0  ;;  %7903 = vst [vmem:[#allocation36_spill] sm:$0xff] %v6419_v37  ;;  %v7905_v0 = vand.u32 4294901760, %v6346_v38  ;;  %v7908_v60 = vand.u32 4294901760, %v6359_v49  ;;  %4097 = vmatprep.subr.mxu0 %v6322_v12  ;;  %v2097_v46 = vand.u32 4294901760, %v2096_v18  ;;  %v7909_v17 = vand.u32 4294901760, %v6335_v16 }
  0xf8   :  { %4121 = vmatpush3.msra.mxu1 %v2076_v3  ;;  %7904 = vst [vmem:[#allocation37_spill] sm:$0xff] %v6423_v52  ;;  %v7907_v3 = vand.u32 4294901760, %v6356_v19  ;;  %4098 = vmatpush3.msra.mxu0 %v6316_v21  ;;  %v7910_v13 = vand.u32 4294901760, %v6383_v59  ;;  %v2104_v18 = vand.u32 4294901760, %v2103_v35  ;;  %v7911_v12 = vand.u32 4294901760, %v6368_v50 }
  0xf9   :  { %v2009_v47 = vsub.f32 %v6346_v38, %v7905_v0  ;;  %4122 = vmatprep.subr.mxu1 %v2195_v9  ;;  %v2222_v48 = vsub.f32 %v6359_v49, %v7908_v60  ;;  %v2110_v9 = vsub.f32 %v6335_v16, %v7909_v17  ;;  %4099 = vmatprep.subr.mxu0 %v6340_v29  ;;  %v7913_v35 = vand.u32 4294901760, %v6407_v61 }
  0xfa   :  { %v2015_v33 = vsub.f32 %v6356_v19, %v7907_v3  ;;  %4123 = vmatpush3.msra.mxu1 %v2083_v39  ;;  %v2216_v3 = vand.u32 4294901760, %v2215_v58  ;;  %v2229_v60 = vsub.f32 %v6383_v59, %v7910_v13  ;;  %v2117_v17 = vsub.f32 %v6368_v50, %v7911_v12  ;;  %4100 = vmatpush3.msra.mxu0 %v6370_v22 }
  0xfb   :  { %4124 = vmatprep.subr.mxu1 %v2202_v15  ;;  %v2010_v39 = vand.u32 4294901760, %v2009_v47  ;;  %v7542_v15 = vand.u32 4294901760, %v6423_v52  ;;  %v2223_v42 = vand.u32 4294901760, %v2222_v48  ;;  %v7912_v13 = vand.u32 4294901760, %v6401_v5  ;;  %4101 = vmatprep.subr.mxu0 %v6379_v4 }
  0xfc   :  { %4125 = vmatpush3.msra.mxu1 %v2090_v40  ;;  %v2016_v58 = vand.u32 4294901760, %v2015_v33  ;;  %v2111_v40 = vand.u32 4294901760, %v2110_v9  ;;  %v2124_v47 = vsub.f32 %v6407_v61, %v7913_v35  ;;  %4102 = vmatpush3.msra.mxu0 %v6388_v62  ;;  %v2230_v12 = vand.u32 4294901760, %v2229_v60  ;;  %v7922_v35 = vld [vmem:[#allocation17_spill] sm:$0xff] }
  0xfd   :  { %4126 = vmatprep.subr.mxu1 %v2209_v45  ;;  %v2236_v0 = vsub.f32 %v6401_v5, %v7912_v13  ;;  %v7914_v45 = vand.u32 4294901760, %v6419_v37  ;;  %2011 = vmatprep.mubr.f32.mxu0 %v2010_v39  ;;  %v2118_v33 = vand.u32 4294901760, %v2117_v17  ;;  %v7918_v17 = vld [vmem:[#allocation26_spill] sm:$0xff]  ;;  %v7920_v13 = vld [vmem:[#allocation13_spill] sm:$0xff] }
  0xfe   :  { %4127 = vmatpush3.msra.mxu1 %v2097_v46  ;;  %v2131_v46 = vsub.f32 %v6423_v52, %v7542_v15  ;;  %2017 = vmatmul.mubr.f32.vlgmr.msra.gmra.mxu0 %v2016_v58  ;;  %v7919_v58 = vld [vmem:[#allocation6_spill] sm:$0xff]  ;;  %v7933_v15 = vld [vmem:[#allocation23_spill] sm:$0xff] }
  0xff   :  { %4128 = vmatprep.subr.mxu1 %v2216_v3  ;;  %v2243_v48 = vsub.f32 %v6419_v37, %v7914_v45  ;;  %v2237_v9 = vand.u32 4294901760, %v2236_v0  ;;  %4141 = vmatprep.subr.mxu0 %v5922_v57  ;;  %v2125_v3 = vand.u32 4294901760, %v2124_v47  ;;  %v7915_v0 = vld [vmem:[#allocation16_spill] sm:$0xff]  ;;  %v7923_v47 = vld [vmem:[#allocation27_spill] sm:$0xff] }
 0x100   :  { %4129 = vmatpush3.msra.mxu1 %v2104_v18  ;;  %4142 = vmatpush3.msra.mxu0 %v5946_v43  ;;  %v2132_v39 = vand.u32 4294901760, %v2131_v46  ;;  %v7917_v18 = vld [vmem:[#allocation14_spill] sm:$0xff]  ;;  %v7925_v45 = vld [vmem:[#allocation19_spill] sm:$0xff]  ;;  %v7928_v46 = vld [vmem:[#allocation21_spill] sm:$0xff] }
 0x101   :  { %4130 = vmatprep.subr.mxu1 %v2223_v42  ;;  %v2244_v60 = vand.u32 4294901760, %v2243_v48  ;;  %4143 = vmatprep.subr.mxu0 %v5952_v53  ;;  %v7916_v42 = vld [vmem:[#allocation11_spill] sm:$0xff]  ;;  %v7926_v48 = vld [vmem:[#allocation8_spill] sm:$0xff] }
 0x102   :  { %4131 = vmatpush3.msra.mxu1 %v2111_v40  ;;  %4144 = vmatpush3.msra.mxu0 %v5967_v32  ;;  %v7921_v40 = vld [vmem:[#allocation30_spill] sm:$0xff] }
 0x103   :  { %4132 = vmatprep.subr.mxu1 %v2230_v12  ;;  %4145 = vmatprep.subr.mxu0 %v5978_v41  ;;  %v7924_v12 = vld [vmem:[#allocation7_spill] sm:$0xff] }
 0x104   :  { %4133 = vmatpush3.msra.mxu1 %v2118_v33  ;;  %4146 = vmatpush3.msra.mxu0 %v5984_v8  ;;  %v7927_v33 = vld [vmem:[#allocation15_spill] sm:$0xff] }
 0x105   :  { %4134 = vmatprep.subr.mxu1 %v2237_v9  ;;  %4147 = vmatprep.subr.mxu0 %v6014_v20  ;;  %v7929_v9 = vld [vmem:[#allocation9_spill] sm:$0xff] }
 0x106   :  { %4135 = vmatpush3.msra.mxu1 %v2125_v3  ;;  %4148 = vmatpush3.msra.mxu0 %v6020_v2  ;;  %v7930_v3 = vld [vmem:[#allocation10_spill] sm:$0xff] }
 0x107   :  { %4136 = vmatprep.subr.mxu1 %v2244_v60  ;;  %4149 = vmatprep.subr.mxu0 %v6055_v54  ;;  %v7931_v60 = vld [vmem:[#allocation24_spill] sm:$0xff] }
 0x108   :  { %4137 = vmatpush3.msra.mxu1 %v2132_v39  ;;  %4150 = vmatpush3.msra.mxu0 %v6028_v27  ;;  %v7932_v39 = vld [vmem:[#allocation5_spill] sm:$0xff] }
 0x109   :  { %2249 = vmatmul.mubr.f32.vlgmr.msra.gmra.mxu1 %v6306_v56  ;;  %4176 = vmatprep.subr.mxu1 %v5888_v7  ;;  %v7934_v56 = vld [vmem:[#allocation20_spill] sm:$0xff] }
 0x10a   :  { %4177 = vmatpush3.msra.mxu1 %v5911_v28  ;;  %4151 = vmatprep.subr.mxu0 %v6066_v51 }
 0x10b   :  { %4178 = vmatprep.subr.mxu1 %v5913_v63  ;;  %4152 = vmatpush3.msra.mxu0 %v6062_v55 }
 0x10c   :  { %4179 = vmatpush3.msra.mxu1 %v5927_v30  ;;  %4153 = vmatprep.subr.mxu0 %v6097_v44 }
 0x10d   :  { %4180 = vmatprep.subr.mxu1 %v7915_v0  ;;  %4154 = vmatpush3.msra.mxu0 %v7916_v42 }
 0x10e   :  { %4181 = vmatpush3.msra.mxu1 %v7917_v18  ;;  %4155 = vmatprep.subr.mxu0 %v7918_v17 }
 0x10f   :  { %4182 = vmatprep.subr.mxu1 %v7919_v58  ;;  %4156 = vmatpush3.msra.mxu0 %v7920_v13 }
 0x110   :  { %4183 = vmatpush3.msra.mxu1 %v7921_v40  ;;  %4157 = vmatprep.subr.mxu0 %v7922_v35 }
 0x111   :  { %4184 = vmatprep.subr.mxu1 %v7923_v47  ;;  %4158 = vmatpush3.msra.mxu0 %v6218_v26 }
 0x112   :  { %4185 = vmatpush3.msra.mxu1 %v7924_v12  ;;  %4159 = vmatprep.subr.mxu0 %v6258_v14 }
 0x113   :  { %4186 = vmatprep.subr.mxu1 %v7925_v45  ;;  %4160 = vmatpush3.msra.mxu0 %v6245_v24 }
 0x114   :  { %4187 = vmatpush3.msra.mxu1 %v7926_v48  ;;  %4161 = vmatprep.subr.mxu0 %v6303_v23 }
 0x115   :  { %4188 = vmatprep.subr.mxu1 %v7927_v33  ;;  %4162 = vmatpush3.msra.mxu0 %v6265_v36 }
 0x116   :  { %4189 = vmatpush3.msra.mxu1 %v7928_v46  ;;  %4163 = vmatprep.subr.mxu0 %v6329_v6 }
 0x117   :  { %4190 = vmatprep.subr.mxu1 %v7929_v9  ;;  %4164 = vmatpush3.msra.mxu0 %v6312_v11 }
 0x118   :  { %4191 = vmatpush3.msra.mxu1 %v7930_v3  ;;  %4165 = vmatprep.subr.mxu0 %v6359_v49 }
 0x119   :  { %4192 = vmatprep.subr.mxu1 %v7931_v60  ;;  %4166 = vmatpush3.msra.mxu0 %v6335_v16 }
 0x11a   :  { %4193 = vmatpush3.msra.mxu1 %v7932_v39  ;;  %4167 = vmatprep.subr.mxu0 %v6383_v59 }
 0x11b   :  { %4194 = vmatprep.subr.mxu1 %v7933_v15  ;;  %4168 = vmatpush3.msra.mxu0 %v6368_v50 }
 0x11c   :  { %4195 = vmatpush3.msra.mxu1 %v7934_v56  ;;  %4169 = vmatprep.subr.mxu0 %v6401_v5 }
 0x11d   :  { %4196 = vmatprep.subr.mxu1 %v6235_v10  ;;  %4170 = vmatpush3.msra.mxu0 %v6407_v61  ;;  %v7936_v10 = vand.u32 4294901760, %v5922_v57  ;;  %v7937_v61 = vld [vmem:[#allocation18_spill] sm:$0xff]  ;;  %v7942_v57 = vand.u32 4294901760, %v5978_v41  ;;  %v7947_v41 = vand.u32 4294901760, %v6356_v19 }
 0x11e   :  { %4197 = vmatpush3.msra.mxu1 %v6208_v1  ;;  %4171 = vmatprep.subr.mxu0 %v6419_v37  ;;  %v7938_v1 = vand.u32 4294901760, %v5946_v43  ;;  %v7939_v37 = vld [vmem:[#allocation29_spill] sm:$0xff]  ;;  %v7943_v43 = vand.u32 4294901760, %v5984_v8  ;;  %v7949_v8 = vand.u32 4294901760, %v6028_v27  ;;  %v7954_v27 = vand.u32 4294901760, %v7918_v17 }
 0x11f   :  { %4198 = vmatprep.subr.mxu1 %v6267_v31  ;;  %4172 = vmatpush3.msra.mxu0 %v6423_v52  ;;  %v7940_v52 = vand.u32 4294901760, %v5952_v53  ;;  %v7944_v53 = vand.u32 4294901760, %v6014_v20  ;;  %v7950_v20 = vand.u32 4294901760, %v6066_v51  ;;  %v7959_v17 = vand.u32 4294901760, %v6245_v24 }
 0x120   :  { %2384 = vmatprep.mubr.f32.mxu0 %v6346_v38  ;;  %4199 = vmatpush3.msra.mxu1 %v6247_v25  ;;  %v7941_v25 = vand.u32 4294901760, %v5967_v32  ;;  %v7945_v32 = vand.u32 4294901760, %v6346_v38  ;;  %v7957_v38 = vand.u32 4294901760, %v6218_v26  ;;  %v123_v26 = vld [vmem:[%s7338_s1 + $0x368] sm:$0xff]  ;;  %v7962_v24 = vand.u32 4294901760, %v6265_v36 }
 0x121   :  { %2387 = vmatmul.mubr.f32.vlgmr.msra.gmra.mxu0 %v6356_v19  ;;  %4200 = vmatprep.subr.mxu1 %v7935_v34  ;;  %v124_v19 = vld [vmem:[%s7338_s1 + $0x370] sm:$0xff] }
 0x122   :  { %4211 = vmatprep.subr.mxu0 %v7936_v10  ;;  %4201 = vmatpush3.msra.mxu1 %v7937_v61  ;;  %v7946_v10 = vand.u32 4294901760, %v6020_v2  ;;  %v7951_v2 = vand.u32 4294901760, %v6062_v55 }
 0x123   :  { %4212 = vmatpush3.msra.mxu0 %v7938_v1  ;;  %4202 = vmatprep.subr.mxu1 %v7939_v37  ;;  %v7948_v1 = vand.u32 4294901760, %v6055_v54  ;;  %v141_v54 = vld [vmem:[%s7338_s1 + $0x3f8] sm:$0xff] }
 0x124   :  { %4213 = vmatprep.subr.mxu0 %v7940_v52  ;;  %4203 = vmatpush3.msra.mxu1 %v6316_v21  ;;  %v6584_v55 = vand.u32 4294901760, %v141_v54  ;;  %v139_v52 = vld [vmem:[%s7338_s1 + $0x3e8] sm:$0xff] }
 0x125   :  { %4214 = vmatpush3.msra.mxu0 %v7941_v25  ;;  %4204 = vmatprep.subr.mxu1 %v6340_v29  ;;  %v7956_v25 = vand.u32 4294901760, %v7922_v35  ;;  %v138_v35 = vld [vmem:[%s7338_s1 + $0x3e0] sm:$0xff] }
 0x126   :  { %4215 = vmatprep.subr.mxu0 %v7942_v57  ;;  %4205 = vmatpush3.msra.mxu1 %v6370_v22  ;;  %v6654_v57 = vand.u32 4294901760, %v138_v35 }
 0x127   :  { %4216 = vmatpush3.msra.mxu0 %v7943_v43  ;;  %4206 = vmatprep.subr.mxu1 %v6379_v4  ;;  %v7967_v43 = vand.u32 4294901760, %v6359_v49  ;;  %v7969_v49 = vand.u32 4294901760, %v6335_v16 }
 0x128   :  { %4217 = vmatprep.subr.mxu0 %v7944_v53  ;;  %4207 = vmatpush3.msra.mxu1 %v6388_v62  ;;  %7966 = vst [vmem:[#allocation14_spill] sm:$0xff] %v6654_v57 }
 0x129   :  { %2491 = vmatprep.mubr.f32.mxu1 %v7945_v32  ;;  %4218 = vmatpush3.msra.mxu0 %v7946_v10  ;;  %v120_v32 = vld [vmem:[%s7338_s1 + $0x350] sm:$0xff] }
 0x12a   :  { %2495 = vmatmul.mubr.f32.vlgmr.msra.gmra.mxu1 %v7947_v41  ;;  %4219 = vmatprep.subr.mxu0 %v7948_v1  ;;  %v7971_v1 = vand.u32 4294901760, %v6383_v59 }
 0x12b   :  { %4246 = vmatprep.subr.mxu1 %v5888_v7  ;;  %4220 = vmatpush3.msra.mxu0 %v7949_v8  ;;  %v7952_v7 = vand.u32 4294901760, %v6097_v44  ;;  %v140_v44 = vld [vmem:[%s7338_s1 + $0x3f0] sm:$0xff] }
 0x12c   :  { %4247 = vmatpush3.msra.mxu1 %v5911_v28  ;;  %4221 = vmatprep.subr.mxu0 %v7950_v20  ;;  %v125_v28 = vld [vmem:[%s7338_s1 + $0x378] sm:$0xff] }
 0x12d   :  { %4248 = vmatprep.subr.mxu1 %v5913_v63  ;;  %4222 = vmatpush3.msra.mxu0 %v7951_v2  ;;  %v7953_v63 = vand.u32 4294901760, %v7916_v42  ;;  %v6589_v51 = vand.u32 4294901760, %v125_v28  ;;  %v6609_v42 = vand.u32 4294901760, %v140_v44 }
 0x12e   :  { %4249 = vmatpush3.msra.mxu1 %v5927_v30  ;;  %4223 = vmatprep.subr.mxu0 %v7952_v7  ;;  %v7955_v30 = vand.u32 4294901760, %v7920_v13  ;;  %v6626_v13 = vand.u32 4294901760, %v124_v19  ;;  %v119_v7 = vld [vmem:[%s7338_s1 + $0x348] sm:$0xff] }
 0x12f   :  { %4250 = vmatprep.subr.mxu1 %v7915_v0  ;;  %4224 = vmatpush3.msra.mxu0 %v7953_v63  ;;  %v7958_v0 = vand.u32 4294901760, %v6258_v14  ;;  %v7960_v14 = vand.u32 4294901760, %v6303_v23  ;;  %v122_v23 = vld [vmem:[%s7338_s1 + $0x360] sm:$0xff]  ;;  %v6649_v36 = vsub.f32 %v140_v44, %v6609_v42 }
 0x130   :  { %4251 = vmatpush3.msra.mxu1 %v7917_v18  ;;  %4225 = vmatprep.subr.mxu0 %v7954_v27  ;;  %v6615_v18 = vsub.f32 %v141_v54, %v6584_v55  ;;  %v6664_v53 = vsub.f32 %v124_v19, %v6626_v13  ;;  %v6709_v54 = vand.u32 4294901760, %v120_v32  ;;  %v7978_v44 = vld [vmem:[#allocation25_spill] sm:$0xff] }
 0x131   :  { %4252 = vmatprep.subr.mxu1 %v7919_v58  ;;  %4226 = vmatpush3.msra.mxu0 %v7955_v30  ;;  %v6621_v58 = vsub.f32 %v125_v28, %v6589_v51  ;;  %v7557_v16 = vand.u32 4294901760, %v6649_v36  ;;  %v6715_v28 = vsub.f32 %v138_v35, %v6654_v57  ;;  %v7977_v30 = vld [vmem:[#allocation31_spill] sm:$0xff]  ;;  %v6746_v35 = vand.u32 4294901760, %v119_v7 }
 0x132   :  { %4253 = vmatpush3.msra.mxu1 %v7921_v40  ;;  %4227 = vmatprep.subr.mxu0 %v7956_v25  ;;  %v6628_v40 = vand.u32 4294901760, %v139_v52  ;;  %7975 = vst [vmem:[#allocation17_spill] sm:$0xff] %v6709_v54  ;;  %v7555_v63 = vand.u32 4294901760, %v6664_v53  ;;  %v7979_v25 = vand.u32 4294901760, %v7978_v44  ;;  %v7990_v44 = vld [vmem:[#allocation22_spill] sm:$0xff] }
 0x133   :  { %4254 = vmatprep.subr.mxu1 %v7923_v47  ;;  %4228 = vmatpush3.msra.mxu0 %v7957_v38  ;;  %v6636_v47 = vand.u32 4294901760, %v123_v26  ;;  %7984 = vst [vmem:[#allocation7_spill] sm:$0xff] %v6746_v35 }
 0x134   :  { %4255 = vmatpush3.msra.mxu1 %v7924_v12  ;;  %4229 = vmatprep.subr.mxu0 %v7958_v0  ;;  %7961 = vst [vmem:[#allocation16_spill] sm:$0xff] %v6628_v40  ;;  %v7964_v12 = vand.u32 4294901760, %v6329_v6  ;;  %v137_v6 = vld [vmem:[%s7338_s1 + $0x3d8] sm:$0xff]  ;;  %v6675_v10 = vsub.f32 %v139_v52, %v6628_v40 }
 0x135   :  { %4256 = vmatprep.subr.mxu1 %v7925_v45  ;;  %4230 = vmatpush3.msra.mxu0 %v7959_v17  ;;  %7963 = vst [vmem:[#allocation11_spill] sm:$0xff] %v6636_v47  ;;  %v7560_v45 = vand.u32 4294901760, %v6615_v18  ;;  %v6688_v8 = vand.u32 4294901760, %v137_v6  ;;  %v7981_v52 = vld [vmem:[#allocation32_spill] sm:$0xff] }
 0x136   :  { %4257 = vmatpush3.msra.mxu1 %v7926_v48  ;;  %4231 = vmatprep.subr.mxu0 %v7960_v14  ;;  %v121_v48 = vld [vmem:[%s7338_s1 + $0x358] sm:$0xff]  ;;  %v7554_v27 = vand.u32 4294901760, %v6675_v10  ;;  %v6744_v14 = vsub.f32 %v6649_v36, %v7557_v16 }
 0x137   :  { %4258 = vmatprep.subr.mxu1 %v7927_v33  ;;  %4232 = vmatpush3.msra.mxu0 %v7962_v24  ;;  %v7965_v33 = vand.u32 4294901760, %v6312_v11  ;;  %v136_v11 = vld [vmem:[%s7338_s1 + $0x3d0] sm:$0xff]  ;;  %v6683_v41 = vand.u32 4294901760, %v121_v48  ;;  %7972 = vst [vmem:[#allocation13_spill] sm:$0xff] %v6688_v8  ;;  %v6693_v20 = vsub.f32 %v6615_v18, %v7560_v45  ;;  %v7982_v0 = vld [vmem:[#allocation36_spill] sm:$0xff] }
 0x138   :  { %4259 = vmatpush3.msra.mxu1 %v7928_v46  ;;  %4233 = vmatprep.subr.mxu0 %v7964_v12  ;;  %v7558_v46 = vand.u32 4294901760, %v6621_v58  ;;  %v6707_v2 = vand.u32 4294901760, %v136_v11  ;;  %v134_v24 = vld [vmem:[%s7338_s1 + $0x3c0] sm:$0xff] }
 0x139   :  { %4260 = vmatprep.subr.mxu1 %v7929_v9  ;;  %4234 = vmatpush3.msra.mxu0 %v7965_v33  ;;  %v6666_v9 = vand.u32 4294901760, %v122_v23  ;;  %7970 = vst [vmem:[#allocation6_spill] sm:$0xff] %v6683_v41  ;;  %v6729_v38 = vsub.f32 %v121_v48, %v6683_v41  ;;  %v7985_v12 = vld [vmem:[#allocation37_spill] sm:$0xff] }
 0x13a   :  { %4261 = vmatpush3.msra.mxu1 %v7930_v3  ;;  %4235 = vmatprep.subr.mxu0 %v7967_v43  ;;  %v6681_v3 = vsub.f32 %v123_v26, %v6636_v47  ;;  %v6705_v59 = vsub.f32 %v6621_v58, %v7558_v46  ;;  %7974 = vst [vmem:[#allocation30_spill] sm:$0xff] %v6707_v2  ;;  %v7983_v26 = vand.u32 4294901760, %v7982_v0  ;;  %v7986_v48 = vand.u32 4294901760, %v7985_v12  ;;  %v115_v46 = vld [vmem:[%s7338_s1 + $0x328] sm:$0xff]  ;;  %v7998_v12 = vld [vmem:[#allocation28_spill] sm:$0xff] }
 0x13b   :  { %7968 = vst [vmem:[#allocation26_spill] sm:$0xff] %v6666_v9  ;;  %4262 = vmatprep.subr.mxu1 %v7931_v60  ;;  %4236 = vmatpush3.msra.mxu0 %v7969_v49  ;;  %v135_v60 = vld [vmem:[%s7338_s1 + $0x3c8] sm:$0xff]  ;;  %v6759_v43 = vsub.f32 %v120_v32, %v6709_v54  ;;  %v7556_v49 = vand.u32 4294901760, %v6715_v28  ;;  %v7561_v0 = vand.u32 4294901760, %v6729_v38 }
 0x13c   :  { %4263 = vmatpush3.msra.mxu1 %v7932_v39  ;;  %4237 = vmatprep.subr.mxu0 %v7971_v1  ;;  %v7973_v39 = vand.u32 4294901760, %v6368_v50  ;;  %v7976_v50 = vand.u32 4294901760, %v6401_v5  ;;  %v6731_v19 = vand.u32 4294901760, %v135_v60  ;;  %v118_v5 = vld [vmem:[%s7338_s1 + $0x340] sm:$0xff]  ;;  %v6763_v1 = vsub.f32 %v136_v11, %v6707_v2  ;;  %v133_v11 = vld [vmem:[%s7338_s1 + $0x3b8] sm:$0xff] }
 0x13d   :  { %4264 = vmatprep.subr.mxu1 %v7933_v15  ;;  %v6721_v15 = vsub.f32 %v122_v23, %v6666_v9  ;;  %v6752_v23 = vsub.f32 %v137_v6, %v6688_v8  ;;  %v6775_v6 = vsub.f32 %v6675_v10, %v7554_v27  ;;  %v6777_v32 = vand.u32 4294901760, %v118_v5 }
 0x13e   :  { %4238 = vmatpush3.msra.mxu0 %v7973_v39  ;;  %4265 = vmatpush3.msra.mxu1 %v7934_v56  ;;  %7980 = vst [vmem:[#allocation27_spill] sm:$0xff] %v6731_v19  ;;  %v7553_v56 = vand.u32 4294901760, %v6681_v3  ;;  %v7987_v39 = vld [vmem:[#allocation34_spill] sm:$0xff]  ;;  %v7563_v27 = vand.u32 4294901760, %v6763_v1 }
 0x13f   :  { %4239 = vmatprep.subr.mxu0 %v7976_v50  ;;  %4266 = vmatprep.subr.mxu1 %v7977_v30  ;;  %v7988_v50 = vld [vmem:[#allocation33_spill] sm:$0xff]  ;;  %7989 = vst [vmem:[#allocation19_spill] sm:$0xff] %v6777_v32  ;;  %v7559_v30 = vand.u32 4294901760, %v6721_v15 }
 0x140   :  { %4240 = vmatpush3.msra.mxu0 %v7979_v25  ;;  %4267 = vmatpush3.msra.mxu1 %v7981_v52  ;;  %v6788_v25 = vsub.f32 %v6681_v3, %v7553_v56  ;;  %v6790_v52 = vand.u32 4294901760, %v134_v24 }
 0x141   :  { %4241 = vmatprep.subr.mxu0 %v7983_v26  ;;  %4268 = vmatprep.subr.mxu1 %v6267_v31  ;;  %v6770_v31 = vsub.f32 %v6664_v53, %v7555_v63  ;;  %v6794_v26 = vsub.f32 %v135_v60, %v6731_v19  ;;  %v6810_v60 = vsub.f32 %v6715_v28, %v7556_v49  ;;  %v7564_v63 = vand.u32 4294901760, %v6759_v43 }
 0x142   :  { %4242 = vmatpush3.msra.mxu0 %v7986_v48  ;;  %2661 = vmatprep.mubr.f32.mxu0 %v7987_v39  ;;  %7991 = vst [vmem:[#allocation8_spill] sm:$0xff] %v6790_v52  ;;  %v7562_v48 = vand.u32 4294901760, %v6752_v23  ;;  %v6824_v49 = vsub.f32 %v118_v5, %v6777_v32  ;;  %v6829_v16 = vsub.f32 %v6721_v15, %v7559_v30  ;;  %v132_v5 = vld [vmem:[%s7338_s1 + $0x3b0] sm:$0xff] }
 0x143   :  { %4269 = vmatpush3.msra.mxu1 %v7988_v50  ;;  %2663 = vmatmul.mubr.f32.vlgmr.msra.gmra.mxu0 %v7990_v44  ;;  %v7993_v50 = vld [vmem:[#allocation12_spill] sm:$0xff]  ;;  %v116_v30 = vld [vmem:[%s7338_s1 + $0x330] sm:$0xff]  ;;  %v7565_v45 = vand.u32 4294901760, %v6794_v26  ;;  %v6876_v33 = vsub.f32 %v6759_v43, %v7564_v63 }
 0x144   :  { %4270 = vmatprep.subr.mxu1 %v7935_v34  ;;  %4281 = vmatprep.subr.mxu0 %v6584_v55  ;;  %v6800_v34 = vsub.f32 %v119_v7, %v6746_v35  ;;  %v161_v56 = vcombine.high %v7993_v50, %v7993_v50  ;;  %v117_v7 = vld [vmem:[%s7338_s1 + $0x338] sm:$0xff]  ;;  %7995 = vst [vmem:[#allocation9_spill] sm:$0xff] %v6824_v49 }
 0x145   :  { %4271 = vmatpush3.msra.mxu1 %v7937_v61  ;;  %4282 = vmatpush3.msra.mxu0 %v6589_v51  ;;  %v6812_v61 = vand.u32 4294901760, %v133_v11  ;;  %v6847_v50 = vsub.f32 %v134_v24, %v6790_v52 }
 0x146   :  { %7992 = vst [vmem:[#allocation15_spill] sm:$0xff] %v6800_v34  ;;  %4272 = vmatprep.subr.mxu1 %v7939_v37  ;;  %4283 = vmatprep.subr.mxu0 %v6609_v42  ;;  %v6863_v24 = vrot.slane %v161_v56, %v7998_v12  ;;  %v6884_v56 = vand.u32 4294901760, %v132_v5  ;;  %v6886_v12 = vand.u32 4294901760, %v116_v30  ;;  %v114_v37 = vld [vmem:[%s7338_s1 + $0x320] sm:$0xff] }
 0x147   :  { %7994 = vst [vmem:[#allocation21_spill] sm:$0xff] %v6812_v61  ;;  %4273 = vmatpush3.msra.mxu1 %v6316_v21  ;;  %4284 = vmatpush3.msra.mxu0 %v6626_v13  ;;  %v6837_v21 = vsub.f32 %v6729_v38, %v7561_v0  ;;  %7996 = vst [vmem:[#allocation10_spill] sm:$0xff] %v6847_v50  ;;  %v6856_v0 = vand.u32 4294901760, %v117_v7  ;;  %v6879_v17 = vsub.f32 %v133_v11, %v6812_v61 }
 0x148   :  { %4274 = vmatprep.subr.mxu1 %v6340_v29  ;;  %4285 = vmatprep.subr.mxu0 %v6628_v40  ;;  %v6854_v29 = vsub.f32 %v6752_v23, %v7562_v48  ;;  %v6871_v48 = vsub.f32 %v6763_v1, %v7563_v27  ;;  %8000 = vst [vmem:[#allocation23_spill] sm:$0xff] %v6884_v56  ;;  %8001 = vst [vmem:[#allocation20_spill] sm:$0xff] %v6886_v12  ;;  %v131_v27 = vld [vmem:[%s7338_s1 + $0x3a8] sm:$0xff] }
 0x149   :  { %4275 = vmatpush3.msra.mxu1 %v6370_v22  ;;  %7997 = vst [vmem:[#allocation24_spill] sm:$0xff] %v6856_v0  ;;  %4286 = vmatpush3.msra.mxu0 %v6636_v47  ;;  %7999 = vst [vmem:[#allocation5_spill] sm:$0xff] %v6879_v17  ;;  %v6910_v11 = vsub.f32 %v117_v7, %v6856_v0  ;;  %v130_v22 = vld [vmem:[%s7338_s1 + $0x3a0] sm:$0xff]  ;;  %v8006_v47 = vand.u32 4294901760, %v6705_v59  ;;  %v127_v59 = vld [vmem:[%s7338_s1 + $0x388] sm:$0xff] }
 0x14a   :  { %4276 = vmatprep.subr.mxu1 %v6379_v4  ;;  %4287 = vmatprep.subr.mxu0 %v6654_v57  ;;  %v6900_v4 = vand.u32 4294901760, %v115_v46  ;;  %v113_v57 = vld [vmem:[%s7338_s1 + $0x318] sm:$0xff] }
 0x14b   :  { %4277 = vmatpush3.msra.mxu1 %v6388_v62  ;;  %2765 = vmatprep.mubr.f32.mxu1 %v7987_v39  ;;  %v6898_v62 = vsub.f32 %v6794_v26, %v7565_v45  ;;  %v3029_v39 = vand.u32 4294901760, %v6854_v29  ;;  %v8003_v45 = vand.u32 4294901760, %v6800_v34  ;;  %v8008_v29 = vand.u32 4294901760, %v6824_v49 }
 0x14c   :  { %4288 = vmatpush3.msra.mxu0 %v6666_v9  ;;  %8002 = vst [vmem:[#allocation35_spill] sm:$0xff] %v6900_v4  ;;  %2767 = vmatmul.mubr.f32.vlgmr.msra.gmra.mxu1 %v7990_v44  ;;  %v177_v9 = vcombine.high %v6863_v24, %v6863_v24  ;;  %v8004_v44 = vand.u32 4294901760, %v6693_v20  ;;  %v6937_v20 = vsub.f32 %v116_v30, %v6886_v12 }
 0x14d   :  { %4289 = vmatprep.subr.mxu0 %v6688_v8  ;;  %v6915_v63 = vsub.f32 %v6800_v34, %v8003_v45  ;;  %v6927_v8 = vand.u32 4294901760, %v131_v27  ;;  %v6944_v7 = vsub.f32 %v6824_v49, %v8008_v29  ;;  %v129_v45 = vld [vmem:[%s7338_s1 + $0x398] sm:$0xff]  ;;  %v6957_v30 = vsub.f32 %v115_v46, %v6900_v4 }
 0x14e   :  { %4316 = vmatprep.subr.mxu1 %v8004_v44  ;;  %4290 = vmatpush3.msra.mxu0 %v6683_v41  ;;  %v6939_v44 = vand.u32 4294901760, %v114_v37  ;;  %v6950_v41 = vsub.f32 %v132_v5, %v6884_v56  ;;  %v8010_v29 = vand.u32 4294901760, %v6847_v50  ;;  %v112_v5 = vld [vmem:[%s7338_s1 + $0x310] sm:$0xff]  ;;  %v6973_v46 = vand.u32 4294901760, %v113_v57 }
 0x14f   :  { %8005 = vst [vmem:[#allocation18_spill] sm:$0xff] %v6927_v8  ;;  %4317 = vmatpush3.msra.mxu1 %v8006_v47  ;;  %4291 = vmatprep.subr.mxu0 %v6707_v2  ;;  %v8009_v47 = vand.u32 4294901760, %v6744_v14  ;;  %v6959_v2 = vand.u32 4294901760, %v130_v22  ;;  %v8011_v14 = vand.u32 4294901760, %v6770_v31  ;;  %v6984_v31 = vand.u32 4294901760, %v129_v45 }
 0x150   :  { %8007 = vst [vmem:[#allocation29_spill] sm:$0xff] %v6939_v44  ;;  %4292 = vmatpush3.msra.mxu0 %v6709_v54  ;;  %v6964_v49 = vsub.f32 %v6847_v50, %v8010_v29  ;;  %8012 = vst [vmem:[#allocation31_spill] sm:$0xff] %v6973_v46  ;;  %v128_v29 = vld [vmem:[%s7338_s1 + $0x390] sm:$0xff]  ;;  %v6979_v54 = vand.u32 4294901760, %v177_v9  ;;  %v8014_v50 = vand.u32 4294901760, %v6775_v6  ;;  %v6998_v34 = vand.u32 4294901760, %v6863_v24 }
 0x151   :  { %4318 = vmatprep.subr.mxu1 %v8009_v47  ;;  %4293 = vmatprep.subr.mxu0 %v6731_v19  ;;  %8015 = vst [vmem:[#allocation32_spill] sm:$0xff] %v6984_v31  ;;  %v6995_v19 = vsub.f32 %v131_v27, %v6927_v8  ;;  %v8018_v6 = vand.u32 4294901760, %v6788_v25  ;;  %v8019_v27 = vand.u32 4294901760, %v6810_v60  ;;  %v7014_v25 = vand.u32 4294901760, %v128_v29 }
 0x152   :  { %4319 = vmatpush3.msra.mxu1 %v8011_v14  ;;  %8013 = vst [vmem:[#allocation25_spill] sm:$0xff] %v6979_v54  ;;  %4294 = vmatpush3.msra.mxu0 %v6746_v35  ;;  %v8016_v14 = vand.u32 4294901760, %v6879_v17  ;;  %8017 = vst [vmem:[#allocation36_spill] sm:$0xff] %v6998_v34  ;;  %v3050_v40 = vand.u32 4294901760, %v6964_v49  ;;  %v8021_v35 = vand.u32 4294901760, %v6829_v16  ;;  %v7027_v60 = vsub.f32 %v113_v57, %v6973_v46 }
 0x153   :  { %4320 = vmatprep.subr.mxu1 %v8014_v50  ;;  %4295 = vmatprep.subr.mxu0 %v6790_v52  ;;  %v7004_v50 = vsub.f32 %v114_v37, %v6939_v44  ;;  %8020 = vst [vmem:[#allocation37_spill] sm:$0xff] %v7014_v25  ;;  %v111_v37 = vld [vmem:[%s7338_s1 + $0x308] sm:$0xff]  ;;  %v8022_v49 = vand.u32 4294901760, %v6910_v11  ;;  %v8025_v52 = vand.u32 4294901760, %v6871_v48 }
 0x154   :  { %v6989_v47 = vsub.f32 %v6879_v17, %v8016_v14  ;;  %4321 = vmatpush3.msra.mxu1 %v8018_v6  ;;  %v2938_v14 = vand.u32 4294901760, %v6944_v7  ;;  %v7008_v17 = vand.u32 4294901760, %v112_v5  ;;  %4296 = vmatpush3.msra.mxu0 %v6777_v32  ;;  %v7021_v7 = vsub.f32 %v130_v22, %v6959_v2  ;;  %v126_v32 = vld [vmem:[%s7338_s1 + $0x380] sm:$0xff] }
 0x155   :  { %4322 = vmatprep.subr.mxu1 %v8019_v27  ;;  %4297 = vmatprep.subr.mxu0 %v6812_v61  ;;  %v2944_v27 = vsub.f32 %v6910_v11, %v8022_v49  ;;  %v7032_v6 = vand.u32 4294901760, %v127_v59  ;;  %v7038_v22 = vsub.f32 %v177_v9, %v6979_v54  ;;  %v7048_v49 = vsub.f32 %v6863_v24, %v6998_v34 }
 0x156   :  { %4323 = vmatpush3.msra.mxu1 %v8021_v35  ;;  %4298 = vmatpush3.msra.mxu0 %v6856_v0  ;;  %v3057_v16 = vand.u32 4294901760, %v6989_v47  ;;  %v110_v35 = vld [vmem:[%s7338_s1 + $0x300] sm:$0xff]  ;;  %v7051_v61 = vsub.f32 %v129_v45, %v6984_v31  ;;  %v8023_v9 = vand.u32 4294901760, %v6837_v21  ;;  %v7060_v57 = vsub.f32 %v112_v5, %v7008_v17  ;;  %s4518_s1 = smov [#allocation2]  }
 0x157   :  { %4324 = vmatprep.subr.mxu1 %v3029_v39  ;;  %4299 = vmatprep.subr.mxu0 %v6884_v56  ;;  %v8024_v39 = vand.u32 4294901760, %v6950_v41  ;;  %v7062_v0 = vand.u32 4294901760, %v111_v37  ;;  %v8026_v21 = vand.u32 4294901760, %v6937_v20  ;;  %v7075_v5 = vsub.f32 %v128_v29, %v7014_v25  ;;  %s3643_s13 = sshll.u32 %s4518_s1, 4  ;;  %s3644_s13 = int_to_ptr.vmem [resolvable:$true] %s3643_s13 }
 0x158   :  { %4325 = vmatpush3.msra.mxu1 %v8023_v9  ;;  %4300 = vmatpush3.msra.mxu0 %v6886_v12  ;;  %v7071_v9 = vand.u32 4294901760, %v126_v32  ;;  %v8027_v56 = vand.u32 4294901760, %v6876_v33  ;;  %v2945_v48 = vand.u32 4294901760, %v2944_v27  ;;  %v8029_v29 = vand.u32 4294901760, %v6995_v19  ;;  %s4495_s14 = scalar_lea.vmem %s3644_s13, 32  ;;  %p4500_p1 = scmp.lt.s32.totalorder %s3644_s13, %s3644_s13 }
 0x159   :  { %v3063_v47 = vsub.f32 %v6950_v41, %v8024_v39  ;;  %4326 = vmatprep.subr.mxu1 %v8025_v52  ;;  %v2951_v45 = vsub.f32 %v6937_v20, %v8026_v21  ;;  %4301 = vmatprep.subr.mxu0 %v6927_v8  ;;  %v7080_v52 = vand.u32 4294901760, %v110_v35  ;;  %v8028_v21 = vand.u32 4294901760, %v6898_v62  ;;  %p4496_p0 = scmp.ne.s32.totalorder %s3644_s13, %s4495_s14  ;;  %p4501_p2 = scmp.lt.s32.totalorder %s4495_s14, %s4495_s14 }
 0x15a   :  { %4327 = vmatpush3.msra.mxu1 %v8027_v56  ;;  %4302 = vmatpush3.msra.mxu0 %v6900_v4  ;;  %v3070_v39 = vsub.f32 %v6995_v19, %v8029_v29  ;;  %v7093_v27 = vsub.f32 %v127_v59, %v7032_v6  ;;  %v8030_v24 = vand.u32 4294901760, %v6915_v63  ;;  %v8032_v12 = vand.u32 4294901760, %v6957_v30 }
 0x15b   :  { %4328 = vmatprep.subr.mxu1 %v8028_v21  ;;  %4303 = vmatprep.subr.mxu0 %v6959_v2  ;;  %v3064_v62 = vand.u32 4294901760, %v3063_v47  ;;  %v7099_v21 = vsub.f32 %v111_v37, %v7062_v0  ;;  %v2952_v59 = vand.u32 4294901760, %v2951_v45  ;;  %v8033_v56 = vand.u32 4294901760, %v7021_v7  ;;  %p4502_p3 = por %p4501_p2, %p4500_p1 }
 0x15c   :  { %4329 = vmatpush3.msra.mxu1 %v8030_v24  ;;  %v2958_v29 = vsub.f32 %v6957_v30, %v8032_v12  ;;  %4304 = vmatpush3.msra.mxu0 %v6939_v44  ;;  %v7111_v47 = vsub.f32 %v126_v32, %v7071_v9  ;;  %v7115_v12 = vsub.f32 %v110_v35, %v7080_v52  ;;  %v8037_v45 = vand.u32 4294901760, %v7004_v50 }
 0x15d   :  { %8031 = vst [vmem:[#allocation34_spill] sm:$0xff] %v7099_v21  ;;  %4330 = vmatprep.subr.mxu1 %v3050_v40  ;;  %v3077_v63 = vsub.f32 %v7021_v7, %v8033_v56  ;;  %4305 = vmatprep.subr.mxu0 %v6984_v31  ;;  %v8036_v40 = vand.u32 4294901760, %v7038_v22  ;;  %v3071_v32 = vand.u32 4294901760, %v3070_v39  ;;  %v8039_v35 = vand.u32 4294901760, %v7051_v61  ;;  %p4503_p4 = pnand %p4502_p3, %p4496_p0 }
 0x15e   :  { %8034 = vst [vmem:[#allocation33_spill] sm:$0xff] %v7111_v47  ;;  %4331 = vmatpush3.msra.mxu1 %v2938_v14  ;;  %8035 = vst [vmem:[#allocation22_spill] sm:$0xff] %v7115_v12  ;;  %v2965_v33 = vsub.f32 %v7004_v50, %v8037_v45  ;;  %4306 = vmatpush3.msra.mxu0 %v6973_v46  ;;  %v8038_v14 = vand.u32 4294901760, %v7048_v49  ;;  %v2959_v45 = vand.u32 4294901760, %v2958_v29  ;;  %v8040_v56 = vand.u32 4294901760, %v7027_v60 }
 0x15f   :  { %v2871_v37 = vsub.f32 %v7038_v22, %v8036_v40  ;;  %4332 = vmatprep.subr.mxu1 %v3057_v16  ;;  %v3084_v31 = vsub.f32 %v7051_v61, %v8039_v35  ;;  %4307 = vmatprep.subr.mxu0 %v7014_v25  ;;  %v8041_v46 = vand.u32 4294901760, %v7075_v5  ;;  %v8042_v25 = vand.u32 4294901760, %v7060_v57 }
 0x160   :  { %v2877_v24 = vsub.f32 %v7048_v49, %v8038_v14  ;;  %4333 = vmatpush3.msra.mxu1 %v2945_v48  ;;  %v2972_v16 = vsub.f32 %v7027_v60, %v8040_v56  ;;  %4308 = vmatpush3.msra.mxu0 %v7008_v17  ;;  %v3078_v14 = vand.u32 4294901760, %v3077_v63  ;;  %v2966_v29 = vand.u32 4294901760, %v2965_v33 }
 0x161   :  { %4334 = vmatprep.subr.mxu1 %v3064_v62  ;;  %v3091_v35 = vsub.f32 %v7075_v5, %v8041_v46  ;;  %4309 = vmatprep.subr.mxu0 %v7032_v6  ;;  %v2872_v48 = vand.u32 4294901760, %v2871_v37  ;;  %v2979_v56 = vsub.f32 %v7060_v57, %v8042_v25  ;;  %v7612_v62 = vand.u32 4294901760, %v7115_v12 }
 0x162   :  { %4335 = vmatpush3.msra.mxu1 %v2952_v59  ;;  %4310 = vmatpush3.msra.mxu0 %v7062_v0  ;;  %v2878_v63 = vand.u32 4294901760, %v2877_v24  ;;  %v3085_v39 = vand.u32 4294901760, %v3084_v31  ;;  %v8043_v46 = vand.u32 4294901760, %v7093_v27  ;;  %v2973_v59 = vand.u32 4294901760, %v2972_v16 }
 0x163   :  { %4336 = vmatprep.subr.mxu1 %v3071_v32  ;;  %4311 = vmatprep.subr.mxu0 %v7071_v9  ;;  %v8044_v33 = vand.u32 4294901760, %v7099_v21  ;;  %v3092_v25 = vand.u32 4294901760, %v3091_v35  ;;  %v8045_v32 = vand.u32 4294901760, %v7111_v47  ;;  %v2980_v24 = vand.u32 4294901760, %v2979_v56  ;;  %v8049_v56 = vld [vmem:[#allocation10_spill] sm:$0xff] }
 0x164   :  { %v3098_v40 = vsub.f32 %v7093_v27, %v8043_v46  ;;  %4337 = vmatpush3.msra.mxu1 %v2959_v45  ;;  %4312 = vmatpush3.msra.mxu0 %v7080_v52  ;;  %v2993_v45 = vsub.f32 %v7115_v12, %v7612_v62  ;;  %v8051_v46 = vld [vmem:[#allocation9_spill] sm:$0xff]  ;;  %v8064_v62 = vld [vmem:[#allocation23_spill] sm:$0xff] }
 0x165   :  { %v2986_v37 = vsub.f32 %v7099_v21, %v8044_v33  ;;  %4338 = vmatprep.subr.mxu1 %v3078_v14  ;;  %v3105_v31 = vsub.f32 %v7111_v47, %v8045_v32  ;;  %2873 = vmatprep.mubr.f32.mxu0 %v2872_v48  ;;  %v8053_v33 = vld [vmem:[#allocation5_spill] sm:$0xff]  ;;  %v8056_v32 = vld [vmem:[#allocation30_spill] sm:$0xff] }
 0x166   :  { %4339 = vmatpush3.msra.mxu1 %v2966_v29  ;;  %2879 = vmatmul.mubr.f32.vlgmr.msra.gmra.mxu0 %v2878_v63  ;;  %v3099_v16 = vand.u32 4294901760, %v3098_v40  ;;  %v2994_v48 = vand.u32 4294901760, %v2993_v45  ;;  %v8046_v40 = vld [vmem:[#allocation16_spill] sm:$0xff]  ;;  %v8048_v29 = vld [vmem:[#allocation11_spill] sm:$0xff]  ;;  %v8050_v63 = vld [vmem:[#allocation14_spill] sm:$0xff] }
 0x167   :  { %4340 = vmatprep.subr.mxu1 %v3085_v39  ;;  %4351 = vmatprep.subr.mxu0 %v6615_v18  ;;  %v2987_v14 = vand.u32 4294901760, %v2986_v37  ;;  %v3106_v35 = vand.u32 4294901760, %v3105_v31  ;;  %v8047_v39 = vld [vmem:[#allocation15_spill] sm:$0xff]  ;;  %v8054_v37 = vld [vmem:[#allocation13_spill] sm:$0xff] }
 0x168   :  { %4341 = vmatpush3.msra.mxu1 %v2973_v59  ;;  %4352 = vmatpush3.msra.mxu0 %v6621_v58  ;;  %v8052_v59 = vld [vmem:[#allocation26_spill] sm:$0xff]  ;;  %v8057_v31 = vld [vmem:[#allocation17_spill] sm:$0xff]  ;;  %v8059_v45 = vld [vmem:[#allocation7_spill] sm:$0xff] }
 0x169   :  { %4342 = vmatprep.subr.mxu1 %v3092_v25  ;;  %4353 = vmatprep.subr.mxu0 %v6649_v36  ;;  %v8055_v25 = vld [vmem:[#allocation6_spill] sm:$0xff] }
 0x16a   :  { %4343 = vmatpush3.msra.mxu1 %v2980_v24  ;;  %4354 = vmatpush3.msra.mxu0 %v6664_v53  ;;  %v8058_v24 = vld [vmem:[#allocation27_spill] sm:$0xff] }
 0x16b   :  { %4344 = vmatprep.subr.mxu1 %v3099_v16  ;;  %4355 = vmatprep.subr.mxu0 %v6675_v10  ;;  %v8060_v16 = vld [vmem:[#allocation8_spill] sm:$0xff] }
 0x16c   :  { %4345 = vmatpush3.msra.mxu1 %v2987_v14  ;;  %4356 = vmatpush3.msra.mxu0 %v6681_v3  ;;  %v8061_v14 = vld [vmem:[#allocation19_spill] sm:$0xff] }
 0x16d   :  { %4346 = vmatprep.subr.mxu1 %v3106_v35  ;;  %4357 = vmatprep.subr.mxu0 %v6715_v28  ;;  %v8062_v35 = vld [vmem:[#allocation21_spill] sm:$0xff] }
 0x16e   :  { %4347 = vmatpush3.msra.mxu1 %v2994_v48  ;;  %3109 = vmatprep.mubr.f32.mxu1 %v6979_v54  ;;  %v8063_v48 = vld [vmem:[#allocation24_spill] sm:$0xff] }
 0x16f   :  { %4358 = vmatpush3.msra.mxu0 %v6721_v15  ;;  %3111 = vmatmul.mubr.f32.vlgmr.msra.gmra.mxu1 %v6998_v34  ;;  %v8065_v34 = vld [vmem:[#allocation20_spill] sm:$0xff] }
 0x170   :  { %4359 = vmatprep.subr.mxu0 %v6752_v23  ;;  %4386 = vmatprep.subr.mxu1 %v6584_v55  ;;  %v8066_v54 = vld [vmem:[#allocation32_spill] sm:$0xff] }
 0x171   :  { %4360 = vmatpush3.msra.mxu0 %v6729_v38  ;;  %4387 = vmatpush3.msra.mxu1 %v6589_v51 }
 0x172   :  { %4361 = vmatprep.subr.mxu0 %v6763_v1  ;;  %4388 = vmatprep.subr.mxu1 %v6609_v42 }
 0x173   :  { %4362 = vmatpush3.msra.mxu0 %v6759_v43  ;;  %4389 = vmatpush3.msra.mxu1 %v6626_v13 }
 0x174   :  { %4363 = vmatprep.subr.mxu0 %v6794_v26  ;;  %4390 = vmatprep.subr.mxu1 %v8046_v40 }
 0x175   :  { %4364 = vmatpush3.msra.mxu0 %v8047_v39  ;;  %4391 = vmatpush3.msra.mxu1 %v8048_v29 }
 0x176   :  { %4365 = vmatprep.subr.mxu0 %v8049_v56  ;;  %4392 = vmatprep.subr.mxu1 %v8050_v63 }
 0x177   :  { %4366 = vmatpush3.msra.mxu0 %v8051_v46  ;;  %4393 = vmatpush3.msra.mxu1 %v8052_v59 }
 0x178   :  { %4367 = vmatprep.subr.mxu0 %v8053_v33  ;;  %4394 = vmatprep.subr.mxu1 %v8054_v37 }
 0x179   :  { %4368 = vmatpush3.msra.mxu0 %v6910_v11  ;;  %4395 = vmatpush3.msra.mxu1 %v8055_v25 }
 0x17a   :  { %4369 = vmatprep.subr.mxu0 %v6950_v41  ;;  %4396 = vmatprep.subr.mxu1 %v8056_v32 }
 0x17b   :  { %4370 = vmatpush3.msra.mxu0 %v6937_v20  ;;  %4397 = vmatpush3.msra.mxu1 %v8057_v31 }
 0x17c   :  { %4371 = vmatprep.subr.mxu0 %v6995_v19  ;;  %4398 = vmatprep.subr.mxu1 %v8058_v24 }
 0x17d   :  { %4372 = vmatpush3.msra.mxu0 %v6957_v30  ;;  %4399 = vmatpush3.msra.mxu1 %v8059_v45 }
 0x17e   :  { %4373 = vmatprep.subr.mxu0 %v7021_v7  ;;  %4400 = vmatprep.subr.mxu1 %v8060_v16 }
 0x17f   :  { %4374 = vmatpush3.msra.mxu0 %v7004_v50  ;;  %4401 = vmatpush3.msra.mxu1 %v8061_v14 }
 0x180   :  { %4375 = vmatprep.subr.mxu0 %v7051_v61  ;;  %4402 = vmatprep.subr.mxu1 %v8062_v35 }
 0x181   :  { %4376 = vmatpush3.msra.mxu0 %v7027_v60  ;;  %4403 = vmatpush3.msra.mxu1 %v8063_v48 }
 0x182   :  { %4377 = vmatprep.subr.mxu0 %v7075_v5  ;;  %4404 = vmatprep.subr.mxu1 %v8064_v62 }
 0x183   :  { %4378 = vmatpush3.msra.mxu0 %v7060_v57  ;;  %4405 = vmatpush3.msra.mxu1 %v8065_v34 }
 0x184   :  { %4379 = vmatprep.subr.mxu0 %v7093_v27  ;;  %4406 = vmatprep.subr.mxu1 %v6927_v8  ;;  %v8067_v8 = vand.u32 4294901760, %v6615_v18  ;;  %v8073_v18 = vand.u32 4294901760, %v6675_v10  ;;  %v8078_v10 = vand.u32 4294901760, %v7048_v49 }
 0x185   :  { %4380 = vmatpush3.msra.mxu0 %v7099_v21  ;;  %4407 = vmatpush3.msra.mxu1 %v6900_v4  ;;  %v8068_v21 = vld [vmem:[#allocation31_spill] sm:$0xff]  ;;  %v8069_v4 = vand.u32 4294901760, %v6621_v58  ;;  %v8074_v58 = vand.u32 4294901760, %v6681_v3  ;;  %v8080_v3 = vand.u32 4294901760, %v6729_v38  ;;  %v8088_v38 = vand.u32 4294901760, %v6910_v11 }
 0x186   :  { %4381 = vmatprep.subr.mxu0 %v7111_v47  ;;  %4408 = vmatprep.subr.mxu1 %v6959_v2  ;;  %v8070_v47 = vld [vmem:[#allocation37_spill] sm:$0xff]  ;;  %v8092_v11 = vand.u32 4294901760, %v6957_v30  ;;  %v8097_v30 = vand.u32 4294901760, %v7075_v5 }
 0x187   :  { %4382 = vmatpush3.msra.mxu0 %v7115_v12  ;;  %3246 = vmatprep.mubr.f32.mxu0 %v7038_v22  ;;  %v8071_v12 = vand.u32 4294901760, %v6649_v36  ;;  %v8075_v36 = vand.u32 4294901760, %v6715_v28  ;;  %v8081_v28 = vand.u32 4294901760, %v6763_v1  ;;  %v8090_v1 = vand.u32 4294901760, %v6937_v20 }
 0x188   :  { %4409 = vmatpush3.msra.mxu1 %v6939_v44  ;;  %3249 = vmatmul.mubr.f32.vlgmr.msra.gmra.mxu0 %v7048_v49  ;;  %v8072_v44 = vand.u32 4294901760, %v6664_v53  ;;  %v8076_v53 = vand.u32 4294901760, %v7038_v22  ;;  %v8094_v20 = vand.u32 4294901760, %v7004_v50  ;;  %v8098_v50 = vand.u32 4294901760, %v7060_v57  ;;  %v8101_v22 = vld [vmem:[#allocation34_spill] sm:$0xff]  ;;  %v8103_v49 = vld [vmem:[#allocation35_spill] sm:$0xff] }
 0x189   :  { %4410 = vmatprep.subr.mxu1 %v8066_v54  ;;  %4421 = vmatprep.subr.mxu0 %v8067_v8  ;;  %v8077_v8 = vand.u32 4294901760, %v6721_v15  ;;  %v8082_v15 = vand.u32 4294901760, %v6759_v43  ;;  %v8089_v43 = vand.u32 4294901760, %v6950_v41  ;;  %v8093_v41 = vand.u32 4294901760, %v7021_v7  ;;  %v8100_v7 = vld [vmem:[#allocation18_spill] sm:$0xff] }
 0x18a   :  { %4411 = vmatpush3.msra.mxu1 %v8068_v21  ;;  %4422 = vmatpush3.msra.mxu0 %v8069_v4  ;;  %v8079_v4 = vand.u32 4294901760, %v6752_v23  ;;  %v8083_v23 = vand.u32 4294901760, %v6794_v26  ;;  %v8091_v26 = vand.u32 4294901760, %v6995_v19  ;;  %v8095_v19 = vand.u32 4294901760, %v7051_v61 }
 0x18b   :  { %4412 = vmatprep.subr.mxu1 %v8070_v47  ;;  %4423 = vmatprep.subr.mxu0 %v8071_v12  ;;  %v8099_v61 = vand.u32 4294901760, %v7093_v27  ;;  %v8104_v12 = vld [vmem:[#allocation33_spill] sm:$0xff]  ;;  %v8110_v27 = vld [vmem:[#allocation36_spill] sm:$0xff] }
 0x18c   :  { %4413 = vmatpush3.msra.mxu1 %v7008_v17  ;;  %4424 = vmatpush3.msra.mxu0 %v8072_v44  ;;  %v8096_v44 = vand.u32 4294901760, %v7027_v60  ;;  %v8102_v60 = vand.u32 4294901760, %v8101_v22  ;;  %v8105_v5 = vand.u32 4294901760, %v8104_v12 }
 0x18d   :  { %4414 = vmatprep.subr.mxu1 %v7032_v6  ;;  %4425 = vmatprep.subr.mxu0 %v8073_v18 }
 0x18e   :  { %4415 = vmatpush3.msra.mxu1 %v7062_v0  ;;  %4426 = vmatpush3.msra.mxu0 %v8074_v58 }
 0x18f   :  { %4416 = vmatprep.subr.mxu1 %v7071_v9  ;;  %4427 = vmatprep.subr.mxu0 %v8075_v36 }
 0x190   :  { %4417 = vmatpush3.msra.mxu1 %v7080_v52  ;;  %3353 = vmatprep.mubr.f32.mxu1 %v8076_v53 }
 0x191   :  { %4428 = vmatpush3.msra.mxu0 %v8077_v8  ;;  %3357 = vmatmul.mubr.f32.vlgmr.msra.gmra.mxu1 %v8078_v10 }
 0x192   :  { %4429 = vmatprep.subr.mxu0 %v8079_v4  ;;  %4456 = vmatprep.subr.mxu1 %v6584_v55  ;;  %v8084_v55 = vand.u32 4294901760, %v8047_v39  ;;  %v3718_v39 = vpop.f32.mrf.mxu1 }
 0x193   :  { %4430 = vmatpush3.msra.mxu0 %v8080_v3  ;;  %4457 = vmatpush3.msra.mxu1 %v6589_v51  ;;  %v8085_v51 = vand.u32 4294901760, %v8049_v56 }
 0x194   :  { %4431 = vmatprep.subr.mxu0 %v8081_v28  ;;  %4458 = vmatprep.subr.mxu1 %v6609_v42  ;;  %v8086_v42 = vand.u32 4294901760, %v8051_v46 }
 0x195   :  { %4432 = vmatpush3.msra.mxu0 %v8082_v15  ;;  %4459 = vmatpush3.msra.mxu1 %v6626_v13  ;;  %v8087_v13 = vand.u32 4294901760, %v8053_v33 }
 0x196   :  { %4433 = vmatprep.subr.mxu0 %v8083_v23  ;;  %4460 = vmatprep.subr.mxu1 %v8046_v40  ;;  %v8108_v40 = vld [vmem:[#allocation25_spill] sm:$0xff] }
 0x197   :  { %4434 = vmatpush3.msra.mxu0 %v8084_v55  ;;  %4461 = vmatpush3.msra.mxu1 %v8048_v29  ;;  %v3719_v29 = vpop.f32.mrf.mxu1 }
 0x198   :  { %4435 = vmatprep.subr.mxu0 %v8085_v51  ;;  %4462 = vmatprep.subr.mxu1 %v8050_v63 }
 0x199   :  { %4436 = vmatpush3.msra.mxu0 %v8086_v42  ;;  %4463 = vmatpush3.msra.mxu1 %v8052_v59  ;;  %v3788_v63 = vpop.f32.mrf.mxu1 }
 0x19a   :  { %4437 = vmatprep.subr.mxu0 %v8087_v13  ;;  %4464 = vmatprep.subr.mxu1 %v8054_v37 }
 0x19b   :  { %4438 = vmatpush3.msra.mxu0 %v8088_v38  ;;  %4465 = vmatpush3.msra.mxu1 %v8055_v25  ;;  %v3789_v46 = vpop.f32.mrf.mxu1 }
 0x19c   :  { %4439 = vmatprep.subr.mxu0 %v8089_v43  ;;  %4466 = vmatprep.subr.mxu1 %v8056_v32  ;;  %v3790_v58 = vadd.f32 %v3789_v46, %v3788_v63 }
 0x19d   :  { %4440 = vmatpush3.msra.mxu0 %v8090_v1  ;;  %4467 = vmatpush3.msra.mxu1 %v8057_v31  ;;  %v3858_v59 = vpop.f32.mrf.mxu1 }
 0x19e   :  { %4441 = vmatprep.subr.mxu0 %v8091_v26  ;;  %4468 = vmatprep.subr.mxu1 %v8058_v24  ;;  %v3720_v24 = vadd.f32 %v3719_v29, %v3718_v39 }
 0x19f   :  { %4442 = vmatpush3.msra.mxu0 %v8092_v11  ;;  %4469 = vmatpush3.msra.mxu1 %v8059_v45  ;;  %v3859_v33 = vpop.f32.mrf.mxu1 }
 0x1a0   :  { %4443 = vmatprep.subr.mxu0 %v8093_v41  ;;  %4470 = vmatprep.subr.mxu1 %v8060_v16  ;;  %v3860_v3 = vadd.f32 %v3859_v33, %v3858_v59 }
 0x1a1   :  { %4444 = vmatpush3.msra.mxu0 %v8094_v20  ;;  %4471 = vmatpush3.msra.mxu1 %v8061_v14  ;;  %v3928_v37 = vpop.f32.mrf.mxu1 }
 0x1a2   :  { %4445 = vmatprep.subr.mxu0 %v8095_v19  ;;  %4472 = vmatprep.subr.mxu1 %v8062_v35 }
 0x1a3   :  { %4446 = vmatpush3.msra.mxu0 %v8096_v44  ;;  %4473 = vmatpush3.msra.mxu1 %v8063_v48  ;;  %v3929_v25 = vpop.f32.mrf.mxu1 }
 0x1a4   :  { %4447 = vmatprep.subr.mxu0 %v8097_v30  ;;  %4474 = vmatprep.subr.mxu1 %v8064_v62  ;;  %v8106_v62 = vld [vmem:[#allocation22_spill] sm:$0xff]  ;;  %v3930_v13 = vadd.f32 %v3929_v25, %v3928_v37 }
 0x1a5   :  { %4448 = vmatpush3.msra.mxu0 %v8098_v50  ;;  %4475 = vmatpush3.msra.mxu1 %v8065_v34  ;;  %v8107_v57 = vand.u32 4294901760, %v8106_v62  ;;  %v8109_v34 = vld [vmem:[#allocation29_spill] sm:$0xff]  ;;  %v3998_v32 = vpop.f32.mrf.mxu1 }
 0x1a6   :  { %4449 = vmatprep.subr.mxu0 %v8099_v61  ;;  %4476 = vmatprep.subr.mxu1 %v8100_v7 }
 0x1a7   :  { %4450 = vmatpush3.msra.mxu0 %v8102_v60  ;;  %4477 = vmatpush3.msra.mxu1 %v8103_v49  ;;  %v3999_v45 = vpop.f32.mrf.mxu1 }
 0x1a8   :  { %4451 = vmatprep.subr.mxu0 %v8105_v5  ;;  %4478 = vmatprep.subr.mxu1 %v6959_v2  ;;  %v3683_v2 = vpop.f32.mrf.mxu0  ;;  %v4000_v20 = vadd.f32 %v3999_v45, %v3998_v32 }
 0x1a9   :  { %4452 = vmatpush3.msra.mxu0 %v8107_v57  ;;  %3523 = vmatprep.mubr.f32.mxu0 %v8108_v40  ;;  %v4068_v48 = vpop.f32.mrf.mxu1 }
 0x1aa   :  { %4479 = vmatpush3.msra.mxu1 %v8109_v34  ;;  %3525 = vmatmul.mubr.f32.vlgmr.msra.gmra.mxu0 %v8110_v27 }
 0x1ab   :  { %4480 = vmatprep.subr.mxu1 %v8066_v54  ;;  %3627 = vmatprep.mubr.f32.mxu1 %v8108_v40  ;;  %v3684_v54 = vpop.f32.mrf.mxu0  ;;  %v4069_v10 = vpop.f32.mrf.mxu1 }
 0x1ac   :  { %4481 = vmatpush3.msra.mxu1 %v8068_v21  ;;  %v3685_v16 = vadd.f32 %v3684_v54, %v3683_v2  ;;  %v4070_v7 = vadd.f32 %v4069_v10, %v4068_v48 }
 0x1ad   :  { %4482 = vmatprep.subr.mxu1 %v8070_v47  ;;  %v3753_v21 = vpop.f32.mrf.mxu0 }
 0x1ae   :  { %4483 = vmatpush3.msra.mxu1 %v7008_v17  ;;  %v527_v18 = vadd.f32 %v3720_v24, %v3685_v16 }
 0x1af   :  { %4484 = vmatprep.subr.mxu1 %v7032_v6  ;;  %v3754_v56 = vpop.f32.mrf.mxu0 }
 0x1b0   :  { %4485 = vmatpush3.msra.mxu1 %v7062_v0  ;;  %v3755_v14 = vadd.f32 %v3754_v56, %v3753_v21 }
 0x1b1   :  { %4486 = vmatprep.subr.mxu1 %v7071_v9  ;;  %v3823_v47 = vpop.f32.mrf.mxu0 }
 0x1b2   :  { %4487 = vmatpush3.msra.mxu1 %v7080_v52  ;;  %v665_v53 = vadd.f32 %v3755_v14, %v527_v18 }
 0x1b3   :  { %3629 = vmatmul.mubr.f32.vlgmr.msra.gmra.mxu1 %v8110_v27  ;;  %v3824_v17 = vpop.f32.mrf.mxu0 }
 0x1b4   :  { %v3825_v8 = vadd.f32 %v3824_v17, %v3823_v47  ;;  %v773_v4 = vadd.f32 %v3790_v58, %v665_v53 }
 0x1b5   :  { %v3893_v6 = vpop.f32.mrf.mxu0 }
 0x1b6   :  { %v941_v23 = vadd.f32 %v3825_v8, %v773_v4 }
 0x1b7   :  { %v3894_v0 = vpop.f32.mrf.mxu0 }
 0x1b8   :  { %v3895_v55 = vadd.f32 %v3894_v0, %v3893_v6  ;;  %v1045_v42 = vadd.f32 %v3860_v3, %v941_v23 }
 0x1b9   :  { %v3963_v9 = vpop.f32.mrf.mxu0 }
 0x1ba   :  { %v1157_v43 = vadd.f32 %v3895_v55, %v1045_v42 }
 0x1bb   :  { %v3964_v52 = vpop.f32.mrf.mxu0 }
 0x1bc   :  { %v3965_v1 = vadd.f32 %v3964_v52, %v3963_v9  ;;  %v1389_v41 = vadd.f32 %v3930_v13, %v1157_v43 }
 0x1bd   :  { %v4033_v31 = vpop.f32.mrf.mxu0 }
 0x1be   :  { %v1527_v44 = vadd.f32 %v3965_v1, %v1389_v41 }
 0x1bf   :  { %v4034_v35 = vpop.f32.mrf.mxu0 }
 0x1c0   :  { %v4035_v30 = vadd.f32 %v4034_v35, %v4033_v31  ;;  %v1635_v61 = vadd.f32 %v4000_v20, %v1527_v44 }
 0x1c1   :  { %v4103_v36 = vpop.f32.mrf.mxu0 }
 0x1c2   :  { %v1803_v49 = vadd.f32 %v4035_v30, %v1635_v61 }
 0x1c3   :  { %v4104_v28 = vpop.f32.mrf.mxu0 }
 0x1c4   :  { %v4105_v12 = vadd.f32 %v4104_v28, %v4103_v36  ;;  %v1907_v62 = vadd.f32 %v4070_v7, %v1803_v49 }
 0x1c6   :  { %v2019_v34 = vadd.f32 %v4105_v12, %v1907_v62 }
 0x1c9   :  { %v4138_v15 = vpop.f32.mrf.mxu1 }
 0x1cb   :  { %v4139_v38 = vpop.f32.mrf.mxu1 }
 0x1cc   :  { %v4140_v57 = vadd.f32 %v4139_v38, %v4138_v15 }
 0x1ce   :  { %v2251_v39 = vadd.f32 %v4140_v57, %v2019_v34 }
 0x1e1   :  { %v4173_v51 = vpop.f32.mrf.mxu0 }
 0x1e3   :  { %v4174_v26 = vpop.f32.mrf.mxu0 }
 0x1e4   :  { %v4175_v27 = vadd.f32 %v4174_v26, %v4173_v51 }
 0x1e6   :  { %v2389_v56 = vadd.f32 %v4175_v27, %v2251_v39 }
 0x1ea   :  { %v4208_v11 = vpop.f32.mrf.mxu1 }
 0x1ec   :  { %v4209_v50 = vpop.f32.mrf.mxu1 }
 0x1ed   :  { %v4210_v21 = vadd.f32 %v4209_v50, %v4208_v11 }
 0x1ef   :  { %v2497_v46 = vadd.f32 %v4210_v21, %v2389_v56 }
 0x203   :  { %v4243_v19 = vpop.f32.mrf.mxu0 }
 0x205   :  { %v4244_v22 = vpop.f32.mrf.mxu0 }
 0x206   :  { %v4245_v63 = vadd.f32 %v4244_v22, %v4243_v19 }
 0x208   :  { %v2665_v33 = vadd.f32 %v4245_v63, %v2497_v46 }
 0x20c   :  { %v4278_v60 = vpop.f32.mrf.mxu1 }
 0x20e   :  { %v4279_v40 = vpop.f32.mrf.mxu1 }
 0x20f   :  { %v4280_v17 = vadd.f32 %v4279_v40, %v4278_v60 }
 0x211   :  { %v2769_v9 = vadd.f32 %v4280_v17, %v2665_v33 }
 0x226   :  { %v4313_v5 = vpop.f32.mrf.mxu0 }
 0x228   :  { %v4314_v2 = vpop.f32.mrf.mxu0 }
 0x229   :  { %v4315_v0 = vadd.f32 %v4314_v2, %v4313_v5 }
 0x22b   :  { %v2881_v32 = vadd.f32 %v4315_v0, %v2769_v9 }
 0x22f   :  { %v4348_v54 = vpop.f32.mrf.mxu1 }
 0x231   :  { %v4349_v47 = vpop.f32.mrf.mxu1 }
 0x232   :  { %v4350_v25 = vadd.f32 %v4349_v47, %v4348_v54 }
 0x234   :  { %v3113_v45 = vadd.f32 %v4350_v25, %v2881_v32 }
 0x248   :  { %v4383_v29 = vpop.f32.mrf.mxu0 }
 0x24a   :  { %v4384_v59 = vpop.f32.mrf.mxu0 }
 0x24b   :  { %v4385_v31 = vadd.f32 %v4384_v59, %v4383_v29 }
 0x24d   :  { %v3251_v14 = vadd.f32 %v4385_v31, %v3113_v45 }
 0x251   :  { %v4418_v6 = vpop.f32.mrf.mxu1 }
 0x253   :  { %v4419_v52 = vpop.f32.mrf.mxu1 }
 0x254   :  { %v4420_v16 = vadd.f32 %v4419_v52, %v4418_v6 }
 0x256   :  { %v3359_v18 = vadd.f32 %v4420_v16, %v3251_v14 }
 0x26a   :  { %v4453_v37 = vpop.f32.mrf.mxu0 }
 0x26c   :  { %v4454_v24 = vpop.f32.mrf.mxu0 }
 0x26d   :  { %v4455_v35 = vadd.f32 %v4454_v24, %v4453_v37 }
 0x26f   :  { %v3527_v36 = vadd.f32 %v4455_v35, %v3359_v18 }
 0x273   :  { %v4488_v48 = vpop.f32.mrf.mxu1 }
 0x275   :  { %v4489_v58 = vpop.f32.mrf.mxu1 }
 0x276   :  { %v4490_v53 = vadd.f32 %v4489_v58, %v4488_v48 }
 0x278   :  { %v3631_v8 = vadd.f32 %v4490_v53, %v3527_v36 }
 0x27a   :  { %v3634_v10 = vmul.f32 0.00390625, %v3631_v8 }
 0x27c   :  { %3636 = vst.msk [vmem:[#allocation2] sm:$0x3] %vm3635_vm0, %v3634_v10 }
 0x27d   :  { %4506 = shalt.err (!%p4503_p4)
}
 0x27e   :  { %3646 = dma.vmem_to_hbm [thread:$0]  %s3644_s13, 32, %s7339_s2, [#allocation3]  }
 0x27f   :  { %4515 = dma.done.wait [#allocation3], 32  }
 0x280   :  { %4516 = vsyncadd [#allocation3], 4294967264 }
 0x281   :  { %3650 = vsyncpa [#allocation3], 1 }

</bundles_post_ra>
